<compile_context>
chip_gen: v6e
topology: v6e:2x2x1
jax: 0.10.0
libtpu: 0.0.40
codegen_flags: <defaults>
</compile_context>

<pallas_src>
import math

import jax
import jax.numpy as jnp
from jax.experimental import pallas as pl
from jax.experimental.pallas import tpu as pltpu


HIDDEN = 512          # hidden width of the MLP (fixed by the module)
OUT_PAD = 128         # lane-dense padded width of the final Dout=1 layer
C_PAD = 128           # lane-padded width of the (one-hot @ folded-emb) matmul
LRELU_SLOPE = 0.2
P_DROP = 0.4


def _round_up(x, m):
    return (x + m - 1) // m * m


# ------------------------------ fused kernel ------------------------------ #
def _forward(labels_ref, img_ref, m2_ref, m3_ref,
             w1i_ref, w1l_ref, b1_ref,
             w2_ref, b2_ref, w3_ref, b3_ref,
             w4_ref, b4_ref, o_ref):
    tb = img_ref.shape[0]
    scale = 1.0 / (1.0 - P_DROP)

    def lrelu(x):                       # 2 VPU ops (max + mul), no select
        return jnp.maximum(x, LRELU_SLOPE * x)

    def dropout(x, m_ref):
        if m_ref is None:               # eval mode: identity
            return x
        return (x * scale) * m_ref[...].astype(jnp.float32)

    # --- label one-hot @ (embedding folded into W1's label half) -----------
    lab = labels_ref[...]                                         # (tb, 1) i32
    cols = jax.lax.broadcasted_iota(jnp.int32, (tb, C_PAD), 1)
    onehot = jnp.where(cols == lab, 1.0, 0.0).astype(jnp.bfloat16)  # (tb, 128)

    # --- layer 1: split matmul (img part + label part), f32 accumulate -----
    h = (jnp.dot(img_ref[...], w1i_ref[...], preferred_element_type=jnp.float32)
         + jnp.dot(onehot, w1l_ref[...], preferred_element_type=jnp.float32)
         + b1_ref[...])
    h = lrelu(h)

    # --- layer 2: Linear -> Dropout(0.4) -> LeakyReLU(0.2) ------------------
    h = (jnp.dot(h.astype(jnp.bfloat16), w2_ref[...],
                 preferred_element_type=jnp.float32) + b2_ref[...])
    h = lrelu(dropout(h, m2_ref))

    # --- layer 3: Linear -> Dropout(0.4) -> LeakyReLU(0.2) ------------------
    h = (jnp.dot(h.astype(jnp.bfloat16), w3_ref[...],
                 preferred_element_type=jnp.float32) + b3_ref[...])
    h = lrelu(dropout(h, m3_ref))

    # --- layer 4: Linear(512, 1), padded to 128 lanes (dense store) ---------
    o_ref[...] = (jnp.dot(h.astype(jnp.bfloat16), w4_ref[...],
                          preferred_element_type=jnp.float32) + b4_ref[...])


def _kernel_train(labels_ref, img_ref, m2_ref, m3_ref,
                  w1i_ref, w1l_ref, b1_ref, w2_ref, b2_ref,
                  w3_ref, b3_ref, w4_ref, b4_ref, o_ref):
    _forward(labels_ref, img_ref, m2_ref, m3_ref, w1i_ref, w1l_ref, b1_ref,
             w2_ref, b2_ref, w3_ref, b3_ref, w4_ref, b4_ref, o_ref)


def _kernel_eval(labels_ref, img_ref,
                 w1i_ref, w1l_ref, b1_ref, w2_ref, b2_ref,
                 w3_ref, b3_ref, w4_ref, b4_ref, o_ref):
    _forward(labels_ref, img_ref, None, None, w1i_ref, w1l_ref, b1_ref,
             w2_ref, b2_ref, w3_ref, b3_ref, w4_ref, b4_ref, o_ref)


# --------------------------- one-time weight prep -------------------------- #
def prepare_params(params, img_shape, n_classes):
    """Split W1, fold the embedding, pad the head, cast to bf16. Run ONCE."""
    P = int(math.prod(img_shape))
    w1 = params["w1"]                                   # (P + n_classes, 512)

    w1_img = w1[:P].astype(jnp.bfloat16)                # (P, 512)

    # Fold emb lookup into the label half of W1, pad to 128 lanes of K.
    w1_lab = jnp.dot(params["emb"], w1[P:])             # (C, 512) f32
    w1_lab = (jnp.zeros((C_PAD, HIDDEN), jnp.float32)
              .at[:n_classes].set(w1_lab)).astype(jnp.bfloat16)

    w4 = (jnp.zeros((HIDDEN, OUT_PAD), jnp.float32)
          .at[:, :1].set(params["w4"])).astype(jnp.bfloat16)
    b4 = jnp.zeros((1, OUT_PAD), jnp.float32).at[0, 0].set(params["b4"][0])

    return {
        "w1_img": w1_img, "w1_lab": w1_lab,
        "b1": params["b1"].reshape(1, HIDDEN).astype(jnp.float32),
        "w2": params["w2"].astype(jnp.bfloat16),
        "b2": params["b2"].reshape(1, HIDDEN).astype(jnp.float32),
        "w3": params["w3"].astype(jnp.bfloat16),
        "b3": params["b3"].reshape(1, HIDDEN).astype(jnp.float32),
        "w4": w4, "b4": b4,
    }


# --------------------------------- wrapper -------------------------------- #
def conditional_discriminator_mlp(prepped, img, labels, *, training=True,
                                  dropout_key=None, tile_b=None):
    B = img.shape[0]
    P = int(math.prod(img.shape[1:]))

    # Batch tile: big enough to feed the MXU, padded so every block is full.
    if tile_b is None:
        tile_b = min(256, _round_up(max(B, 1), 16))
    B_pad = _round_up(B, tile_b)
    grid = (B_pad // tile_b,)

    img_flat = img.reshape(B, P).astype(jnp.bfloat16)   # == img.view(B, -1)
    labels_flat = labels.astype(jnp.int32).reshape(B)
    if B_pad != B:
        img_flat = jnp.pad(img_flat, ((0, B_pad - B), (0, 0)))
        labels_flat = jnp.pad(labels_flat, (0, B_pad - B))
    labels_2d = labels_flat.reshape(B_pad, 1)

    def batch_spec(width):
        return pl.BlockSpec((tile_b, width), lambda i: (i, 0))

    def fixed_spec(shape):
        return pl.BlockSpec(shape, lambda i: (0,) * len(shape))

    inputs = [labels_2d, img_flat]
    in_specs = [batch_spec(1), batch_spec(P)]

    if training:
        if dropout_key is None:
            dropout_key = jax.random.PRNGKey(0)
        k2, k3 = jax.random.split(dropout_key)
        # TODO(synk): dropout mask draws cannot match PyTorch's RNG stream.
        m2 = jax.random.bernoulli(k2, 1.0 - P_DROP,
                                  (B_pad, HIDDEN)).astype(jnp.bfloat16)
        m3 = jax.random.bernoulli(k3, 1.0 - P_DROP,
                                  (B_pad, HIDDEN)).astype(jnp.bfloat16)
        inputs += [m2, m3]
        in_specs += [batch_spec(HIDDEN), batch_spec(HIDDEN)]
        kernel = _kernel_train
    else:
        kernel = _kernel_eval

    weights = [prepped["w1_img"], prepped["w1_lab"], prepped["b1"],
               prepped["w2"], prepped["b2"],
               prepped["w3"], prepped["b3"],
               prepped["w4"], prepped["b4"]]
    weight_specs = [fixed_spec(tuple(w.shape)) for w in weights]

    flops = 2 * B_pad * (P * HIDDEN + C_PAD * HIDDEN
                         + 2 * HIDDEN * HIDDEN + HIDDEN * OUT_PAD)
    bytes_accessed = (2 * B_pad * (P + (2 * HIDDEN if training else 0))   # bf16
                      + 4 * B_pad * (1 + OUT_PAD)                         # i32/f32
                      + 2 * ((P + C_PAD) * HIDDEN + 2 * HIDDEN * HIDDEN
                             + HIDDEN * OUT_PAD)                          # bf16 W
                      + 4 * (3 * HIDDEN + OUT_PAD))                       # f32 b

    out = pl.pallas_call(
        kernel,
        out_shape=jax.ShapeDtypeStruct((B_pad, OUT_PAD), jnp.float32),
        grid=grid,
        in_specs=in_specs + weight_specs,
        out_specs=pl.BlockSpec((tile_b, OUT_PAD), lambda i: (i, 0)),
        compiler_params=pltpu.CompilerParams(
            dimension_semantics=("parallel",)),
        cost_estimate=pl.CostEstimate(flops=flops, transcendentals=0,
                                      bytes_accessed=bytes_accessed),
    )(*inputs, *weights)

    return out[:B, :1]                                   # validity: (B, 1)


# ------------------------------- parameters ------------------------------- #
def init_params(key, img_shape, n_classes):
    """PyTorch-default init; Linear weights stored as (in_features, out_features)."""
    P = int(math.prod(img_shape))
    d_in = n_classes + P
    ks = jax.random.split(key, 9)

    def lin(kw, kb, din, dout):
        bound = 1.0 / math.sqrt(din)
        w = jax.random.uniform(kw, (din, dout), jnp.float32, -bound, bound)
        b = jax.random.uniform(kb, (dout,), jnp.float32, -bound, bound)
        return w, b

    emb = jax.random.normal(ks[0], (n_classes, n_classes), jnp.float32)  # N(0,1)
    w1, b1 = lin(ks[1], ks[2], d_in, HIDDEN)
    w2, b2 = lin(ks[3], ks[4], HIDDEN, HIDDEN)
    w3, b3 = lin(ks[5], ks[6], HIDDEN, HIDDEN)
    w4, b4 = lin(ks[7], ks[8], HIDDEN, 1)
    return {"emb": emb, "w1": w1, "b1": b1, "w2": w2, "b2": b2,
            "w3": w3, "b3": b3, "w4": w4, "b4": b4}


# --------------------------- plain-JAX reference --------------------------- #
def _reference_eval(params, img, labels):
    """Eval-mode (dropout = identity) reference with matching bf16 matmuls."""
    B = img.shape[0]
    x = img.reshape(B, -1)
    emb = params["emb"][labels]
    d_in = jnp.concatenate([x, emb], axis=-1)

    def lin(v, w, b):
        return jnp.dot(v.astype(jnp.bfloat16), w.astype(jnp.bfloat16),
                       preferred_element_type=jnp.float32) + b

    def lrelu(v):
        return jnp.maximum(v, LRELU_SLOPE * v)

    h = lrelu(lin(d_in, params["w1"], params["b1"]))
    h = lrelu(lin(h, params["w2"], params["b2"]))
    h = lrelu(lin(h, params["w3"], params["b3"]))
    return lin(h, params["w4"], params["b4"])


# ----------------------------------- main ---------------------------------- #
if __name__ == "__main__":
    img_shape = (4, 16, 16)      # (C, H, W) -> prod = 1024
    n_classes = 10
    batch = 2

    key = jax.random.PRNGKey(0)
    k_param, k_img, k_lab, k_drop = jax.random.split(key, 4)
    params = init_params(k_param, img_shape, n_classes)
    prepped = prepare_params(params, img_shape, n_classes)

    img = jax.random.normal(k_img, (batch,) + img_shape, jnp.float32)
    labels = jax.random.randint(k_lab, (batch,), 0, n_classes, jnp.int32)

    # Eval-mode run: deterministic, checked against a plain-JAX reference.
    out_eval = jax.block_until_ready(
        conditional_discriminator_mlp(prepped, img, labels, training=False))
    ref = _reference_eval(params, img, labels)
    assert out_eval.shape == (batch, 1), out_eval.shape
    assert float(jnp.max(jnp.abs(out_eval - ref))) < 5e-2

    # Training-mode run (dropout active via streamed keep-masks).
    out_train = jax.block_until_ready(
        conditional_discriminator_mlp(prepped, img, labels,
                                      training=True, dropout_key=k_drop))
    assert out_train.shape == (batch, 1), out_train.shape
    assert bool(jnp.all(jnp.isfinite(out_train)))

    print("KERNEL_OK")
</pallas_src>

<mosaic_0001>
module attributes {stable_mosaic.version = 11 : i64} {
  func.func @_kernel_eval(%arg0: i32, %arg1: memref<16x1xi32, #tpu.memory_space<vmem>>, %arg2: memref<16x1024xbf16, #tpu.memory_space<vmem>>, %arg3: memref<1024x512xbf16, #tpu.memory_space<vmem>>, %arg4: memref<128x512xbf16, #tpu.memory_space<vmem>>, %arg5: memref<1x512xf32, #tpu.memory_space<vmem>>, %arg6: memref<512x512xbf16, #tpu.memory_space<vmem>>, %arg7: memref<1x512xf32, #tpu.memory_space<vmem>>, %arg8: memref<512x512xbf16, #tpu.memory_space<vmem>>, %arg9: memref<1x512xf32, #tpu.memory_space<vmem>>, %arg10: memref<512x128xbf16, #tpu.memory_space<vmem>>, %arg11: memref<1x128xf32, #tpu.memory_space<vmem>>, %arg12: memref<16x128xf32, #tpu.memory_space<vmem>>) attributes {dimension_semantics = [#tpu.dimension_semantics<parallel>], iteration_bounds = array<i64: 1>, scalar_prefetch = 0 : i64, scratch_operands = 0 : i64, tpu.core_type = #tpu.core_type<tc>, window_params = [{transform_indices = @transform_0, window_bounds = array<i64: 16, 1>}, {transform_indices = @transform_1, window_bounds = array<i64: 16, 1024>}, {pipeline_mode = #tpu.pipeline_mode<synchronous>, transform_indices = @transform_2, window_bounds = array<i64: 1024, 512>}, {pipeline_mode = #tpu.pipeline_mode<synchronous>, transform_indices = @transform_3, window_bounds = array<i64: 128, 512>}, {pipeline_mode = #tpu.pipeline_mode<synchronous>, transform_indices = @transform_4, window_bounds = array<i64: 1, 512>}, {pipeline_mode = #tpu.pipeline_mode<synchronous>, transform_indices = @transform_5, window_bounds = array<i64: 512, 512>}, {pipeline_mode = #tpu.pipeline_mode<synchronous>, transform_indices = @transform_6, window_bounds = array<i64: 1, 512>}, {pipeline_mode = #tpu.pipeline_mode<synchronous>, transform_indices = @transform_7, window_bounds = array<i64: 512, 512>}, {pipeline_mode = #tpu.pipeline_mode<synchronous>, transform_indices = @transform_8, window_bounds = array<i64: 1, 512>}, {pipeline_mode = #tpu.pipeline_mode<synchronous>, transform_indices = @transform_9, window_bounds = array<i64: 512, 128>}, {pipeline_mode = #tpu.pipeline_mode<synchronous>, transform_indices = @transform_10, window_bounds = array<i64: 1, 128>}, {transform_indices = @transform_11, window_bounds = array<i64: 16, 128>}]} {
    %c0 = arith.constant 0 : index
    %c0_0 = arith.constant 0 : index
    %0 = vector.load %arg1[%c0, %c0_0] : memref<16x1xi32, #tpu.memory_space<vmem>>, vector<16x1xi32>
    %1 = tpu.iota {dimensions = array<i32: 1>} : vector<16x128xi32>
    %2 = vector.broadcast %0 : vector<16x1xi32> to vector<16x128xi32>
    %3 = arith.cmpi eq, %1, %2 : vector<16x128xi32>
    %cst = arith.constant 1.000000e+00 : f32
    %cst_1 = arith.constant 0.000000e+00 : f32
    %4 = vector.broadcast %cst : f32 to vector<16x128xf32>
    %5 = vector.broadcast %cst_1 : f32 to vector<16x128xf32>
    %6 = arith.select %3, %4, %5 : vector<16x128xi1>, vector<16x128xf32>
    %7 = arith.truncf %6 : vector<16x128xf32> to vector<16x128xbf16>
    %c0_2 = arith.constant 0 : index
    %c0_3 = arith.constant 0 : index
    %8 = vector.load %arg2[%c0_2, %c0_3] : memref<16x1024xbf16, #tpu.memory_space<vmem>>, vector<16x1024xbf16>
    %c0_4 = arith.constant 0 : index
    %c0_5 = arith.constant 0 : index
    %9 = vector.load %arg3[%c0_4, %c0_5] : memref<1024x512xbf16, #tpu.memory_space<vmem>>, vector<1024x512xbf16>
    %cst_6 = arith.constant dense<0.000000e+00> : vector<16x512xf32>
    %10 = tpu.matmul %8, %9, %cst_6 {dimension_numbers = #tpu.dot_dimension_numbers<[1], [0], [0], [1], [0, 0, 1, 1], [], []>} : vector<16x1024xbf16>, vector<1024x512xbf16>, vector<16x512xf32> -> vector<16x512xf32>
    %c0_7 = arith.constant 0 : index
    %c0_8 = arith.constant 0 : index
    %11 = vector.load %arg4[%c0_7, %c0_8] : memref<128x512xbf16, #tpu.memory_space<vmem>>, vector<128x512xbf16>
    %cst_9 = arith.constant dense<0.000000e+00> : vector<16x512xf32>
    %12 = tpu.matmul %7, %11, %cst_9 {dimension_numbers = #tpu.dot_dimension_numbers<[1], [0], [0], [1], [0, 0, 1, 1], [], []>} : vector<16x128xbf16>, vector<128x512xbf16>, vector<16x512xf32> -> vector<16x512xf32>
    %13 = arith.addf %10, %12 : vector<16x512xf32>
    %c0_10 = arith.constant 0 : index
    %c0_11 = arith.constant 0 : index
    %14 = vector.load %arg5[%c0_10, %c0_11] : memref<1x512xf32, #tpu.memory_space<vmem>>, vector<1x512xf32>
    %15 = vector.broadcast %14 : vector<1x512xf32> to vector<16x512xf32>
    %16 = arith.addf %13, %15 : vector<16x512xf32>
    %cst_12 = arith.constant 2.000000e-01 : f32
    %17 = vector.broadcast %cst_12 : f32 to vector<16x512xf32>
    %18 = arith.mulf %17, %16 : vector<16x512xf32>
    %19 = arith.maximumf %16, %18 : vector<16x512xf32>
    %20 = arith.truncf %19 : vector<16x512xf32> to vector<16x512xbf16>
    %c0_13 = arith.constant 0 : index
    %c0_14 = arith.constant 0 : index
    %21 = vector.load %arg6[%c0_13, %c0_14] : memref<512x512xbf16, #tpu.memory_space<vmem>>, vector<512x512xbf16>
    %cst_15 = arith.constant dense<0.000000e+00> : vector<16x512xf32>
    %22 = tpu.matmul %20, %21, %cst_15 {dimension_numbers = #tpu.dot_dimension_numbers<[1], [0], [0], [1], [0, 0, 1, 1], [], []>} : vector<16x512xbf16>, vector<512x512xbf16>, vector<16x512xf32> -> vector<16x512xf32>
    %c0_16 = arith.constant 0 : index
    %c0_17 = arith.constant 0 : index
    %23 = vector.load %arg7[%c0_16, %c0_17] : memref<1x512xf32, #tpu.memory_space<vmem>>, vector<1x512xf32>
    %24 = vector.broadcast %23 : vector<1x512xf32> to vector<16x512xf32>
    %25 = arith.addf %22, %24 : vector<16x512xf32>
    %cst_18 = arith.constant 2.000000e-01 : f32
    %26 = vector.broadcast %cst_18 : f32 to vector<16x512xf32>
    %27 = arith.mulf %26, %25 : vector<16x512xf32>
    %28 = arith.maximumf %25, %27 : vector<16x512xf32>
    %29 = arith.truncf %28 : vector<16x512xf32> to vector<16x512xbf16>
    %c0_19 = arith.constant 0 : index
    %c0_20 = arith.constant 0 : index
    %30 = vector.load %arg8[%c0_19, %c0_20] : memref<512x512xbf16, #tpu.memory_space<vmem>>, vector<512x512xbf16>
    %cst_21 = arith.constant dense<0.000000e+00> : vector<16x512xf32>
    %31 = tpu.matmul %29, %30, %cst_21 {dimension_numbers = #tpu.dot_dimension_numbers<[1], [0], [0], [1], [0, 0, 1, 1], [], []>} : vector<16x512xbf16>, vector<512x512xbf16>, vector<16x512xf32> -> vector<16x512xf32>
    %c0_22 = arith.constant 0 : index
    %c0_23 = arith.constant 0 : index
    %32 = vector.load %arg9[%c0_22, %c0_23] : memref<1x512xf32, #tpu.memory_space<vmem>>, vector<1x512xf32>
    %33 = vector.broadcast %32 : vector<1x512xf32> to vector<16x512xf32>
    %34 = arith.addf %31, %33 : vector<16x512xf32>
    %cst_24 = arith.constant 2.000000e-01 : f32
    %35 = vector.broadcast %cst_24 : f32 to vector<16x512xf32>
    %36 = arith.mulf %35, %34 : vector<16x512xf32>
    %37 = arith.maximumf %34, %36 : vector<16x512xf32>
    %38 = arith.truncf %37 : vector<16x512xf32> to vector<16x512xbf16>
    %c0_25 = arith.constant 0 : index
    %c0_26 = arith.constant 0 : index
    %39 = vector.load %arg10[%c0_25, %c0_26] : memref<512x128xbf16, #tpu.memory_space<vmem>>, vector<512x128xbf16>
    %cst_27 = arith.constant dense<0.000000e+00> : vector<16x128xf32>
    %40 = tpu.matmul %38, %39, %cst_27 {dimension_numbers = #tpu.dot_dimension_numbers<[1], [0], [0], [1], [0, 0, 1, 1], [], []>} : vector<16x512xbf16>, vector<512x128xbf16>, vector<16x128xf32> -> vector<16x128xf32>
    %c0_28 = arith.constant 0 : index
    %c0_29 = arith.constant 0 : index
    %41 = vector.load %arg11[%c0_28, %c0_29] : memref<1x128xf32, #tpu.memory_space<vmem>>, vector<1x128xf32>
    %42 = vector.broadcast %41 : vector<1x128xf32> to vector<16x128xf32>
    %43 = arith.addf %40, %42 : vector<16x128xf32>
    %c0_30 = arith.constant 0 : index
    %c0_31 = arith.constant 0 : index
    %44 = vector.load %arg12[%c0_30, %c0_31] : memref<16x128xf32, #tpu.memory_space<vmem>>, vector<16x128xf32>
    tpu.vector_store %arg12[%c0_30, %c0_31], %43 {strides = array<i32>} : memref<16x128xf32, #tpu.memory_space<vmem>>, vector<16x128xf32>,
    return
  }
  func.func @transform_0(%arg0: i32) -> (i32, i32) {
    %c0_i32 = arith.constant 0 : i32
    %c0_i32_0 = arith.constant 0 : i32
    return %arg0, %c0_i32 : i32, i32
  }
  func.func @transform_1(%arg0: i32) -> (i32, i32) {
    %c0_i32 = arith.constant 0 : i32
    %c0_i32_0 = arith.constant 0 : i32
    return %arg0, %c0_i32 : i32, i32
  }
  func.func @transform_2(%arg0: i32) -> (i32, i32) {
    %c0_i32 = arith.constant 0 : i32
    %c0_i32_0 = arith.constant 0 : i32
    %c0_i32_1 = arith.constant 0 : i32
    return %c0_i32, %c0_i32_0 : i32, i32
  }
  func.func @transform_3(%arg0: i32) -> (i32, i32) {
    %c0_i32 = arith.constant 0 : i32
    %c0_i32_0 = arith.constant 0 : i32
    %c0_i32_1 = arith.constant 0 : i32
    return %c0_i32, %c0_i32_0 : i32, i32
  }
  func.func @transform_4(%arg0: i32) -> (i32, i32) {
    %c0_i32 = arith.constant 0 : i32
    %c0_i32_0 = arith.constant 0 : i32
    %c0_i32_1 = arith.constant 0 : i32
    return %c0_i32, %c0_i32_0 : i32, i32
  }
  func.func @transform_5(%arg0: i32) -> (i32, i32) {
    %c0_i32 = arith.constant 0 : i32
    %c0_i32_0 = arith.constant 0 : i32
    %c0_i32_1 = arith.constant 0 : i32
    return %c0_i32, %c0_i32_0 : i32, i32
  }
  func.func @transform_6(%arg0: i32) -> (i32, i32) {
    %c0_i32 = arith.constant 0 : i32
    %c0_i32_0 = arith.constant 0 : i32
    %c0_i32_1 = arith.constant 0 : i32
    return %c0_i32, %c0_i32_0 : i32, i32
  }
  func.func @transform_7(%arg0: i32) -> (i32, i32) {
    %c0_i32 = arith.constant 0 : i32
    %c0_i32_0 = arith.constant 0 : i32
    %c0_i32_1 = arith.constant 0 : i32
    return %c0_i32, %c0_i32_0 : i32, i32
  }
  func.func @transform_8(%arg0: i32) -> (i32, i32) {
    %c0_i32 = arith.constant 0 : i32
    %c0_i32_0 = arith.constant 0 : i32
    %c0_i32_1 = arith.constant 0 : i32
    return %c0_i32, %c0_i32_0 : i32, i32
  }
  func.func @transform_9(%arg0: i32) -> (i32, i32) {
    %c0_i32 = arith.constant 0 : i32
    %c0_i32_0 = arith.constant 0 : i32
    %c0_i32_1 = arith.constant 0 : i32
    return %c0_i32, %c0_i32_0 : i32, i32
  }
  func.func @transform_10(%arg0: i32) -> (i32, i32) {
    %c0_i32 = arith.constant 0 : i32
    %c0_i32_0 = arith.constant 0 : i32
    %c0_i32_1 = arith.constant 0 : i32
    return %c0_i32, %c0_i32_0 : i32, i32
  }
  func.func @transform_11(%arg0: i32) -> (i32, i32) {
    %c0_i32 = arith.constant 0 : i32
    %c0_i32_0 = arith.constant 0 : i32
    return %arg0, %c0_i32 : i32, i32
  }
}

</mosaic_0001>

<bundles_post_ra>
// kernel: tpu_custom_call.1
= control target key start
LH: loop header
LB: loop body
LE: loop exit
PB: predicated region body
PF: predicated region fallthrough
CT: control target
= control target key end

     0   :  { %16 = vsyncpa [#allocation3], 0  ;;  %s6633_s0 = inlined_call_operand.vmem [shape: s32[16,1], index: 0, kind: input, shape index: {}]   ;;  %s6634_s1 = inlined_call_operand.hbm [shape: bf16[16,1024], index: 1, kind: input, shape index: {}]   ;;  %s6635_s2 = inlined_call_operand.hbm [shape: bf16[1024,512], index: 2, kind: input, shape index: {}]   ;;  %s6636_s3 = inlined_call_operand.hbm [shape: bf16[128,512], index: 3, kind: input, shape index: {}]   ;;  %s6637_s4 = inlined_call_operand.vmem [shape: f32[1,512], index: 4, kind: input, shape index: {}]   ;;  %s6638_s5 = inlined_call_operand.hbm [shape: bf16[512,512], index: 5, kind: input, shape index: {}]   ;;  %s6639_s6 = inlined_call_operand.vmem [shape: f32[1,512], index: 6, kind: input, shape index: {}]   ;;  %s6640_s7 = inlined_call_operand.hbm [shape: bf16[512,512], index: 7, kind: input, shape index: {}]   ;;  %s6641_s8 = inlined_call_operand.vmem [shape: f32[1,512], index: 8, kind: input, shape index: {}]   ;;  %s6642_s9 = inlined_call_operand.hbm [shape: bf16[512,128], index: 9, kind: input, shape index: {}]   ;;  %s6643_s10 = inlined_call_operand.vmem [shape: f32[1,128], index: 10, kind: input, shape index: {}]   ;;  %s6644_s11 = inlined_call_operand.hbm [shape: f32[16,128], index: 11, kind: output, shape index: {}]  }
   0x1   :  { %17 = vsyncpa [#allocation6], 0 }
   0x2   :  { %18 = vsyncpa [#allocation9], 0 }
   0x3   :  { %19 = vsyncpa [#allocation12], 0 }
   0x4   :  { %20 = vsyncpa [#allocation4], 0  ;;  %s6373_s17 = smov [#allocation5]  }
   0x5   :  { %s40_s18 = sshll.u32 %s6373_s17, 4  ;;  %s41_s18 = int_to_ptr.vmem [resolvable:$true] %s40_s18 }
   0x6   :  { %s6231_s19 = scalar_lea.vmem %s41_s18, 32768  ;;  %p6236_p1 = scmp.lt.s32.totalorder %s41_s18, %s41_s18 }
   0x7   :  { %p6232_p0 = scmp.ne.s32.totalorder %s41_s18, %s6231_s19  ;;  %p6237_p2 = scmp.lt.s32.totalorder %s6231_s19, %s6231_s19 }
   0x9   :  { %p6238_p3 = por %p6237_p2, %p6236_p1 }
   0xb   :  { %p6239_p4 = pnand %p6238_p3, %p6232_p0 }
   0xd   :  { %6242 = shalt.err (!%p6239_p4)
}
   0xe   :  { %s6374_s20 = smov 256   ;;  %s6375_s21 = smov 16  }
   0xf   :  { %46 = dma.hbm_to_vmem [thread:$0]  %s6635_s2, 32768, %s41_s18, [#allocation6], %s6374_s20, %s6374_s20, %s6375_s21  }
  0x10   :  { %s6376_s24 = smov [#allocation8]   ;;  %s6377_s26 = smov [#allocation2]  }
  0x11   :  { %s66_s25 = sshll.u32 %s6376_s24, 4  ;;  %s28_s27 = sshll.u32 %s6377_s26, 4  ;;  %s67_s25 = int_to_ptr.vmem [resolvable:$true] %s66_s25  ;;  %s29_s27 = int_to_ptr.vmem [resolvable:$true] %s28_s27 }
  0x12   :  { %s6251_s28 = scalar_lea.vmem %s67_s25, 16384  ;;  %p6256_p6 = scmp.lt.s32.totalorder %s67_s25, %s67_s25 }
  0x13   :  { %p6252_p5 = scmp.ne.s32.totalorder %s67_s25, %s6251_s28  ;;  %p6257_p7 = scmp.lt.s32.totalorder %s6251_s28, %s6251_s28 }
  0x15   :  { %p6258_p8 = por %p6257_p7, %p6256_p6 }
  0x17   :  { %p6259_p9 = pnand %p6258_p8, %p6252_p5 }
  0x19   :  { %6262 = shalt.err (!%p6259_p9)
}
  0x1a   :  { %72 = dma.hbm_to_vmem [thread:$0]  %s6638_s5, 16384, %s67_s25, [#allocation9], %s6374_s20, %s6374_s20, %s6375_s21  }
  0x1b   :  { %s6271_s2 = scalar_lea.vmem %s29_s27, 1024  ;;  %p6276_p11 = scmp.lt.s32.totalorder %s29_s27, %s29_s27 }
  0x1c   :  { %p6272_p10 = scmp.ne.s32.totalorder %s29_s27, %s6271_s2  ;;  %p6277_p12 = scmp.lt.s32.totalorder %s6271_s2, %s6271_s2 }
  0x1e   :  { %p6278_p13 = por %p6277_p12, %p6276_p11 }
  0x20   :  { %p6279_p0 = pnand %p6278_p13, %p6272_p10 }
  0x22   :  { %6282 = shalt.err (!%p6279_p0)
}
  0x23   :  { %s6378_s12 = smov 512   ;;  %s6379_s13 = smov 32  }
  0x24   :  { %34 = dma.hbm_to_vmem [thread:$0]  %s6634_s1, 1024, %s29_s27, [#allocation3], %s6378_s12, %s6378_s12, %s6379_s13  }
  0x25   :  { %s6380_s16 = smov [#allocation7]   ;;  %s6381_s18 = smov [#allocation10]  }
  0x26   :  { %s52_s17 = sshll.u32 %s6380_s16, 4  ;;  %s80_s19 = sshll.u32 %s6381_s18, 4  ;;  %s53_s17 = int_to_ptr.vmem [resolvable:$true] %s52_s17  ;;  %s81_s19 = int_to_ptr.vmem [resolvable:$true] %s80_s19 }
  0x27   :  { %s6291_s5 = scalar_lea.vmem %s53_s17, 4096  ;;  %p6296_p2 = scmp.lt.s32.totalorder %s53_s17, %s53_s17 }
  0x28   :  { %p6292_p1 = scmp.ne.s32.totalorder %s53_s17, %s6291_s5  ;;  %p6297_p3 = scmp.lt.s32.totalorder %s6291_s5, %s6291_s5 }
  0x2a   :  { %p6298_p4 = por %p6297_p3, %p6296_p2 }
  0x2c   :  { %p6299_p5 = pnand %p6298_p4, %p6292_p1 }
  0x2e   :  { %6302 = shalt.err (!%p6299_p5)
}
  0x2f   :  { %58 = dma.hbm_to_vmem [thread:$0]  %s6636_s3, 4096, %s53_s17, [#allocation6], %s6374_s20, %s6374_s20, %s6375_s21  }
  0x30   :  { %s6311_s1 = scalar_lea.vmem %s81_s19, 16384  ;;  %p6316_p7 = scmp.lt.s32.totalorder %s81_s19, %s81_s19 }
  0x31   :  { %p6312_p6 = scmp.ne.s32.totalorder %s81_s19, %s6311_s1  ;;  %p6317_p8 = scmp.lt.s32.totalorder %s6311_s1, %s6311_s1 }
  0x33   :  { %p6318_p9 = por %p6317_p8, %p6316_p7 }
  0x35   :  { %p6319_p10 = pnand %p6318_p9, %p6312_p6 }
  0x37   :  { %6322 = shalt.err (!%p6319_p10)
}
  0x38   :  { %86 = dma.hbm_to_vmem [thread:$0]  %s6640_s7, 16384, %s81_s19, [#allocation9], %s6374_s20, %s6374_s20, %s6375_s21  }
  0x39   :  { %s6382_s26 = smov [#allocation11]  }
  0x3a   :  { %s94_s27 = sshll.u32 %s6382_s26, 4  ;;  %s95_s27 = int_to_ptr.vmem [resolvable:$true] %s94_s27 }
  0x3b   :  { %s6331_s28 = scalar_lea.vmem %s95_s27, 4096  ;;  %p6336_p12 = scmp.lt.s32.totalorder %s95_s27, %s95_s27 }
  0x3c   :  { %p6332_p11 = scmp.ne.s32.totalorder %s95_s27, %s6331_s28  ;;  %p6337_p13 = scmp.lt.s32.totalorder %s6331_s28, %s6331_s28 }
  0x3e   :  { %p6338_p0 = por %p6337_p13, %p6336_p12 }
  0x40   :  { %p6339_p1 = pnand %p6338_p0, %p6332_p11 }
  0x42   :  { %6342 = shalt.err (!%p6339_p1)
}
  0x43   :  { %s6383_s3 = smov 64   ;;  %s6384_s29 = smov 4  }
  0x44   :  { %100 = dma.hbm_to_vmem [thread:$0]  %s6642_s9, 4096, %s95_s27, [#allocation12], %s6383_s3, %s6383_s3, %s6384_s29  }
  0x45   :  { %6363 = dma.done.wait [#allocation3], 1024  }
  0x46   :  { %6364 = vsyncadd [#allocation3], 4294966272 }
  0x47   :  { %6365 = dma.done.wait [#allocation6], 36864  }
  0x48   :  { %6366 = vsyncadd [#allocation6], 4294930432 }
  0x49   :  { %6367 = dma.done.wait [#allocation9], 32768  }
  0x4a   :  { %6368 = vsyncadd [#allocation9], 4294934528 }
  0x4b   :  { %6369 = dma.done.wait [#allocation12], 4096  }
  0x4c   :  { %6370 = vsyncadd [#allocation12], 4294963200  ;;  %v6385_v0 = vmov 0   ;;  %v122_v1 = vld [vmem:[%s6633_s0] sm:$0xff]  ;;  %v123_v2 = vld [vmem:[%s6633_s0 + $0x8] sm:$0xff]  ;;  %v124_v37 = vlaneseq  ;;  %s6387_s16 = smov [#allocation13]  }
  0x4d   :  { %5374 = vset.pattern.permute.xlu0 %v6385_v0  ;;  %625 = vmatprep.mubr.bf16.mxu0 %v6385_v0  ;;  %v5375_v3 = vld [vmem:[#allocation7 + $0xe4] ss:$16 sps:$4 sm:$0xff]   ;;  %v5377_v4 = vld [vmem:[#allocation7 + $0xec] ss:$16 sps:$4 sm:$0xff]   ;;  %v5379_v5 = vld [vmem:[#allocation7 + $0xe0] ss:$16 sps:$4 sm:$0xff]  }
  0x4e   :  { %668 = vmatprep.mubr.bf16.mxu1 %v6385_v0  ;;  %127 = vperm.xlu0 %5374, %v122_v1   ;;  %v5380_v6 = vld [vmem:[#allocation7 + $0xe8] ss:$16 sps:$4 sm:$0xff]   ;;  %v5381_v7 = vld [vmem:[#allocation7 + $0xc4] ss:$16 sps:$4 sm:$0xff]   ;;  %v5383_v8 = vld [vmem:[#allocation7 + $0xcc] ss:$16 sps:$4 sm:$0xff]  }
  0x4f   :  { %593 = vmatprep.subr.bf16.mxu0 %v5375_v3  ;;  %636 = vmatprep.subr.bf16.mxu1 %v5377_v4  ;;  %v5385_v9 = vld [vmem:[#allocation7 + $0xc0] ss:$16 sps:$4 sm:$0xff]   ;;  %v5386_v10 = vld [vmem:[#allocation7 + $0xc8] ss:$16 sps:$4 sm:$0xff]   ;;  %v5387_v11 = vld [vmem:[#allocation7 + $0xa4] ss:$16 sps:$4 sm:$0xff]  }
  0x50   :  { %594 = vmatpush1.bf16.msra.mxu0 %v5379_v5  ;;  %637 = vmatpush1.bf16.msra.mxu1 %v5380_v6  ;;  %v5389_v12 = vld [vmem:[#allocation7 + $0xac] ss:$16 sps:$4 sm:$0xff]   ;;  %v5391_v13 = vld [vmem:[#allocation7 + $0xa0] ss:$16 sps:$4 sm:$0xff]   ;;  %v5392_v14 = vld [vmem:[#allocation7 + $0xa8] ss:$16 sps:$4 sm:$0xff]  }
  0x51   :  { %595 = vmatprep.subr.bf16.mxu0 %v5381_v7  ;;  %638 = vmatprep.subr.bf16.mxu1 %v5383_v8  ;;  %v5393_v15 = vld [vmem:[#allocation7 + $0x84] ss:$16 sps:$4 sm:$0xff]   ;;  %v5395_v16 = vld [vmem:[#allocation7 + $0x8c] ss:$16 sps:$4 sm:$0xff]   ;;  %v5397_v17 = vld [vmem:[#allocation7 + $0x80] ss:$16 sps:$4 sm:$0xff]  }
  0x52   :  { %130 = vperm.xlu0 %5374, %v123_v2   ;;  %v5398_v18 = vld [vmem:[#allocation7 + $0x88] ss:$16 sps:$4 sm:$0xff]   ;;  %v5399_v19 = vld [vmem:[#allocation7 + $0x64] ss:$16 sps:$4 sm:$0xff]   ;;  %v5401_v20 = vld [vmem:[#allocation7 + $0x6c] ss:$16 sps:$4 sm:$0xff]  }
  0x53   :  { %v5403_v21 = vld [vmem:[#allocation7 + $0x60] ss:$16 sps:$4 sm:$0xff]   ;;  %v5404_v22 = vld [vmem:[#allocation7 + $0x68] ss:$16 sps:$4 sm:$0xff]   ;;  %v5405_v23 = vld [vmem:[#allocation7 + $0x44] ss:$16 sps:$4 sm:$0xff]  }
  0x54   :  { %596 = vmatpush1.bf16.msra.mxu0 %v5385_v9  ;;  %639 = vmatpush1.bf16.msra.mxu1 %v5386_v10  ;;  %v5407_v24 = vld [vmem:[#allocation7 + $0x4c] ss:$16 sps:$4 sm:$0xff]   ;;  %v5409_v25 = vld [vmem:[#allocation7 + $0x40] ss:$16 sps:$4 sm:$0xff]   ;;  %v5410_v26 = vld [vmem:[#allocation7 + $0x48] ss:$16 sps:$4 sm:$0xff]  }
  0x55   :  { %597 = vmatprep.subr.bf16.mxu0 %v5387_v11  ;;  %640 = vmatprep.subr.bf16.mxu1 %v5389_v12  ;;  %v5411_v27 = vld [vmem:[#allocation7 + $0x24] ss:$16 sps:$4 sm:$0xff]   ;;  %v5413_v28 = vld [vmem:[#allocation7 + $0x2c] ss:$16 sps:$4 sm:$0xff]   ;;  %v5415_v29 = vld [vmem:[#allocation7 + $0x20] ss:$16 sps:$4 sm:$0xff]  }
  0x56   :  { %v5416_v30 = vld [vmem:[#allocation7 + $0x28] ss:$16 sps:$4 sm:$0xff]   ;;  %v5417_v31 = vld [vmem:[#allocation7 + $0x4] ss:$16 sps:$4 sm:$0xff]   ;;  %v5419_v32 = vld [vmem:[#allocation7 + $0xc] ss:$16 sps:$4 sm:$0xff]  }
  0x57   :  { %v5421_v33 = vld [vmem:[#allocation7] ss:$16 sps:$4 sm:$0xff]   ;;  %v5422_v34 = vld [vmem:[#allocation7 + $0x8] ss:$16 sps:$4 sm:$0xff]   ;;  %v5425_v35 = vld [vmem:[#allocation5 + $0xe4] ss:$16 sps:$4 sm:$0xff]  }
  0x58   :  { %598 = vmatpush1.bf16.msra.mxu0 %v5391_v13  ;;  %641 = vmatpush1.bf16.msra.mxu1 %v5392_v14  ;;  %v5428_v36 = vld [vmem:[#allocation5 + $0x2e4] ss:$16 sps:$4 sm:$0xff]   ;;  %v125_v39 = vand.u32 127, %v124_v37  ;;  %v5423_v41 = vld [vmem:[#allocation5 + $0xe0] ss:$16 sps:$4 sm:$0xff]   ;;  %v6491_v43 = vld [vmem:[#allocation2 + $0x8] sm:$0xff] }
  0x59   :  { %599 = vmatprep.subr.bf16.mxu0 %v5393_v15  ;;  %642 = vmatprep.subr.bf16.mxu1 %v5395_v16  ;;  %v6487_v40 = vld [vmem:[#allocation2] sm:$0xff]  ;;  %v6493_v44 = vld [vmem:[#allocation2 + $0x28] sm:$0xff]  ;;  %v6386_v51 = vmov 1.0|1.0   ;;  %s4709_s17 = sshll.u32 %s6387_s16, 4  ;;  %s4710_s17 = int_to_ptr.vmem [resolvable:$true] %s4709_s17 }
  0x5a   :  { %v6489_v42 = vld [vmem:[#allocation2 + $0x20] sm:$0xff]  ;;  %v6501_v50 = vcombine.high %v6491_v43, %v6493_v44  ;;  %s6343_s18 = scalar_lea.vmem %s4710_s17, 256  ;;  %p6348_p3 = scmp.lt.s32.totalorder %s4710_s17, %s4710_s17 }
  0x5b   :  { %v5426_v46 = vld [vmem:[#allocation5 + $0x2e0] ss:$16 sps:$4 sm:$0xff]   ;;  %v5431_v47 = vld [vmem:[#allocation5 + $0xc4] ss:$16 sps:$4 sm:$0xff]   ;;  %v6497_v49 = vcombine.high %v6487_v40, %v6489_v42  ;;  %p6344_p2 = scmp.ne.s32.totalorder %s4710_s17, %s6343_s18  ;;  %p6349_p4 = scmp.lt.s32.totalorder %s6343_s18, %s6343_s18 }
  0x5c   :  { %600 = vmatpush1.bf16.msra.mxu0 %v5397_v17  ;;  %643 = vmatpush1.bf16.msra.mxu1 %v5398_v18  ;;  %v5434_v48 = vld [vmem:[#allocation5 + $0x2c4] ss:$16 sps:$4 sm:$0xff]   ;;  %v5429_v52 = vld [vmem:[#allocation5 + $0xc0] ss:$16 sps:$4 sm:$0xff]  }
  0x5d   :  { %601 = vmatprep.subr.bf16.mxu0 %v5399_v19  ;;  %644 = vmatprep.subr.bf16.mxu1 %v5401_v20  ;;  %v5432_v53 = vld [vmem:[#allocation5 + $0x2c0] ss:$16 sps:$4 sm:$0xff]   ;;  %v5437_v54 = vld [vmem:[#allocation5 + $0xa4] ss:$16 sps:$4 sm:$0xff]   ;;  %p6350_p5 = por %p6349_p4, %p6348_p3 }
  0x5e   :  { %v5440_v55 = vld [vmem:[#allocation5 + $0x2a4] ss:$16 sps:$4 sm:$0xff]   ;;  %v5435_v56 = vld [vmem:[#allocation5 + $0xa0] ss:$16 sps:$4 sm:$0xff]  }
  0x5f   :  { %v5438_v57 = vld [vmem:[#allocation5 + $0x2a0] ss:$16 sps:$4 sm:$0xff]   ;;  %v5443_v58 = vld [vmem:[#allocation5 + $0x84] ss:$16 sps:$4 sm:$0xff]   ;;  %p6351_p6 = pnand %p6350_p5, %p6344_p2 }
  0x60   :  { %602 = vmatpush1.bf16.msra.mxu0 %v5403_v21  ;;  %645 = vmatpush1.bf16.msra.mxu1 %v5404_v22  ;;  %v5446_v59 = vld [vmem:[#allocation5 + $0x284] ss:$16 sps:$4 sm:$0xff]   ;;  %v5441_v60 = vld [vmem:[#allocation5 + $0x80] ss:$16 sps:$4 sm:$0xff]  }
  0x61   :  { %603 = vmatprep.subr.bf16.mxu0 %v5405_v23  ;;  %646 = vmatprep.subr.bf16.mxu1 %v5407_v24  ;;  %v5444_v61 = vld [vmem:[#allocation5 + $0x280] ss:$16 sps:$4 sm:$0xff]   ;;  %v5449_v62 = vld [vmem:[#allocation5 + $0x64] ss:$16 sps:$4 sm:$0xff]  }
  0x62   :  { %v5452_v63 = vld [vmem:[#allocation5 + $0x264] ss:$16 sps:$4 sm:$0xff]   ;;  %v5447_v0 = vld [vmem:[#allocation5 + $0x60] ss:$16 sps:$4 sm:$0xff]  }
  0x63   :  { %v5450_v1 = vld [vmem:[#allocation5 + $0x260] ss:$16 sps:$4 sm:$0xff]   ;;  %v5455_v2 = vld [vmem:[#allocation5 + $0x44] ss:$16 sps:$4 sm:$0xff]  }
  0x64   :  { %604 = vmatpush1.bf16.msra.mxu0 %v5409_v25  ;;  %647 = vmatpush1.bf16.msra.mxu1 %v5410_v26  ;;  %v5458_v3 = vld [vmem:[#allocation5 + $0x244] ss:$16 sps:$4 sm:$0xff]   ;;  %v5453_v4 = vld [vmem:[#allocation5 + $0x40] ss:$16 sps:$4 sm:$0xff]  }
  0x65   :  { %605 = vmatprep.subr.bf16.mxu0 %v5411_v27  ;;  %648 = vmatprep.subr.bf16.mxu1 %v5413_v28  ;;  %v5456_v5 = vld [vmem:[#allocation5 + $0x240] ss:$16 sps:$4 sm:$0xff]   ;;  %v5461_v6 = vld [vmem:[#allocation5 + $0x24] ss:$16 sps:$4 sm:$0xff]  }
  0x66   :  { %v5464_v7 = vld [vmem:[#allocation5 + $0x224] ss:$16 sps:$4 sm:$0xff]   ;;  %v5459_v8 = vld [vmem:[#allocation5 + $0x20] ss:$16 sps:$4 sm:$0xff]  }
  0x67   :  { %v5462_v9 = vld [vmem:[#allocation5 + $0x220] ss:$16 sps:$4 sm:$0xff]   ;;  %v5467_v10 = vld [vmem:[#allocation5 + $0x4] ss:$16 sps:$4 sm:$0xff]  }
  0x68   :  { %606 = vmatpush1.bf16.msra.mxu0 %v5415_v29  ;;  %649 = vmatpush1.bf16.msra.mxu1 %v5416_v30  ;;  %v5470_v11 = vld [vmem:[#allocation5 + $0x204] ss:$16 sps:$4 sm:$0xff]   ;;  %v5465_v12 = vld [vmem:[#allocation5] ss:$16 sps:$4 sm:$0xff]  }
  0x69   :  { %607 = vmatprep.subr.bf16.mxu0 %v5417_v31  ;;  %650 = vmatprep.subr.bf16.mxu1 %v5419_v32  ;;  %v5468_v13 = vld [vmem:[#allocation5 + $0x200] ss:$16 sps:$4 sm:$0xff]   ;;  %v5473_v14 = vld [vmem:[#allocation5 + $0x1e4] ss:$16 sps:$4 sm:$0xff]  }
  0x6a   :  { %v5476_v15 = vld [vmem:[#allocation5 + $0x3e4] ss:$16 sps:$4 sm:$0xff]   ;;  %v5471_v16 = vld [vmem:[#allocation5 + $0x1e0] ss:$16 sps:$4 sm:$0xff]  }
  0x6b   :  { %v5474_v17 = vld [vmem:[#allocation5 + $0x3e0] ss:$16 sps:$4 sm:$0xff]   ;;  %v5479_v18 = vld [vmem:[#allocation5 + $0x1c4] ss:$16 sps:$4 sm:$0xff]  }
  0x6c   :  { %608 = vmatpush1.bf16.msra.mxu0 %v5421_v33  ;;  %651 = vmatpush1.bf16.msra.mxu1 %v5422_v34  ;;  %v5482_v19 = vld [vmem:[#allocation5 + $0x3c4] ss:$16 sps:$4 sm:$0xff]   ;;  %v5477_v20 = vld [vmem:[#allocation5 + $0x1c0] ss:$16 sps:$4 sm:$0xff]  }
  0x6d   :  { %1999 = vmatprep.subr.bf16.mxu0 %v5425_v35  ;;  %2042 = vmatprep.subr.bf16.mxu1 %v5428_v36  ;;  %v5480_v21 = vld [vmem:[#allocation5 + $0x3c0] ss:$16 sps:$4 sm:$0xff]   ;;  %v5485_v22 = vld [vmem:[#allocation5 + $0x1a4] ss:$16 sps:$4 sm:$0xff]  }
  0x6e   :  { %v5488_v23 = vld [vmem:[#allocation5 + $0x3a4] ss:$16 sps:$4 sm:$0xff]   ;;  %v5483_v24 = vld [vmem:[#allocation5 + $0x1a0] ss:$16 sps:$4 sm:$0xff]  }
  0x6f   :  { %v5486_v25 = vld [vmem:[#allocation5 + $0x3a0] ss:$16 sps:$4 sm:$0xff]   ;;  %v5491_v26 = vld [vmem:[#allocation5 + $0x184] ss:$16 sps:$4 sm:$0xff]  }
  0x70   :  { %v5494_v27 = vld [vmem:[#allocation5 + $0x384] ss:$16 sps:$4 sm:$0xff]   ;;  %v5489_v28 = vld [vmem:[#allocation5 + $0x180] ss:$16 sps:$4 sm:$0xff]  }
  0x71   :  { %v5492_v29 = vld [vmem:[#allocation5 + $0x380] ss:$16 sps:$4 sm:$0xff]   ;;  %v5497_v30 = vld [vmem:[#allocation5 + $0x164] ss:$16 sps:$4 sm:$0xff]  }
  0x72   :  { %v5500_v31 = vld [vmem:[#allocation5 + $0x364] ss:$16 sps:$4 sm:$0xff]   ;;  %v5495_v32 = vld [vmem:[#allocation5 + $0x160] ss:$16 sps:$4 sm:$0xff]  }
  0x73   :  { %v5498_v33 = vld [vmem:[#allocation5 + $0x360] ss:$16 sps:$4 sm:$0xff]   ;;  %v5503_v34 = vld [vmem:[#allocation5 + $0x144] ss:$16 sps:$4 sm:$0xff]  }
  0x74   :  { %v5506_v35 = vld [vmem:[#allocation5 + $0x344] ss:$16 sps:$4 sm:$0xff]   ;;  %v5501_v36 = vld [vmem:[#allocation5 + $0x140] ss:$16 sps:$4 sm:$0xff]  }
  0xc9   :  { %v128_v38 = vpop.permute.xlu0 %127 }
  0xca   :  { %vm132_vm0 = vcmp.eq.s32.totalorder %v125_v39, %v128_v38  ;;  %v5504_v38 = vld [vmem:[#allocation5 + $0x340] ss:$16 sps:$4 sm:$0xff]  }
  0xcd   :  { %v131_v45 = vpop.permute.xlu0 %130 }
  0xce   :  { %vm133_vm1 = vcmp.eq.s32.totalorder %v125_v39, %v131_v45  ;;  %v5509_v39 = vld [vmem:[#allocation5 + $0x124] ss:$16 sps:$4 sm:$0xff]   ;;  %v5507_v45 = vld [vmem:[#allocation5 + $0x120] ss:$16 sps:$4 sm:$0xff]  }
  0xcf   :  { %vm4756_vm2 = vmpackc.low %vm133_vm1, %vm132_vm0 }
  0xd0   :  { %4757 = vmatmul.mubr.msk.bf16.vlgmr.msra.gmra.mxu0 %vm4756_vm2, %v6386_v51  ;;  %4759 = vmatmul.mubr.msk.bf16.vlgmr.msra.gmra.mxu1 %vm4756_vm2, %v6386_v51  ;;  %v5513_v51 = vld [vmem:[#allocation5 + $0x100] ss:$16 sps:$4 sm:$0xff]  }
  0xd1   :  { %2000 = vmatpush1.bf16.msra.mxu0 %v5423_v41  ;;  %2043 = vmatpush1.bf16.msra.mxu1 %v5426_v46  ;;  %v5512_v41 = vld [vmem:[#allocation5 + $0x324] ss:$16 sps:$4 sm:$0xff]   ;;  %v5510_v46 = vld [vmem:[#allocation5 + $0x320] ss:$16 sps:$4 sm:$0xff]  }
  0xd2   :  { %2001 = vmatprep.subr.bf16.mxu0 %v5431_v47  ;;  %2044 = vmatprep.subr.bf16.mxu1 %v5434_v48  ;;  %v5515_v47 = vld [vmem:[#allocation5 + $0x104] ss:$16 sps:$4 sm:$0xff]  }
  0xd3   :  { %2031 = vmatprep.mubr.bf16.mxu0 %v6497_v49  ;;  %2074 = vmatprep.mubr.bf16.mxu1 %v6501_v50  ;;  %v5518_v48 = vld [vmem:[#allocation5 + $0x304] ss:$16 sps:$4 sm:$0xff]  }
  0xd5   :  { %2002 = vmatpush1.bf16.msra.mxu0 %v5429_v52  ;;  %2045 = vmatpush1.bf16.msra.mxu1 %v5432_v53  ;;  %v5516_v52 = vld [vmem:[#allocation5 + $0x300] ss:$16 sps:$4 sm:$0xff]   ;;  %v5521_v53 = vld [vmem:[#allocation5 + $0x4e4] ss:$16 sps:$4 sm:$0xff]  }
  0xd6   :  { %2003 = vmatprep.subr.bf16.mxu0 %v5437_v54  ;;  %2046 = vmatprep.subr.bf16.mxu1 %v5440_v55  ;;  %v5524_v54 = vld [vmem:[#allocation5 + $0x6e4] ss:$16 sps:$4 sm:$0xff]  }
  0xd7   :  { %v6505_v55 = vld [vmem:[#allocation2 + $0x10] sm:$0xff] }
  0xd9   :  { %2004 = vmatpush1.bf16.msra.mxu0 %v5435_v56  ;;  %2047 = vmatpush1.bf16.msra.mxu1 %v5438_v57  ;;  %v6507_v56 = vld [vmem:[#allocation2 + $0x30] sm:$0xff]  ;;  %v6509_v57 = vld [vmem:[#allocation2 + $0x18] sm:$0xff] }
  0xda   :  { %2005 = vmatprep.subr.bf16.mxu0 %v5443_v58  ;;  %2048 = vmatprep.subr.bf16.mxu1 %v5446_v59  ;;  %v6511_v58 = vld [vmem:[#allocation2 + $0x38] sm:$0xff]  ;;  %v5519_v59 = vld [vmem:[#allocation5 + $0x4e0] ss:$16 sps:$4 sm:$0xff]  }
  0xdd   :  { %2006 = vmatpush1.bf16.msra.mxu0 %v5441_v60  ;;  %2049 = vmatpush1.bf16.msra.mxu1 %v5444_v61  ;;  %v5522_v60 = vld [vmem:[#allocation5 + $0x6e0] ss:$16 sps:$4 sm:$0xff]   ;;  %v6515_v61 = vcombine.low %v6487_v40, %v6489_v42  ;;  %v6527_v40 = vcombine.high %v6509_v57, %v6511_v58  ;;  %v5533_v42 = vld [vmem:[#allocation5 + $0x4a4] ss:$16 sps:$4 sm:$0xff]  }
  0xde   :  { %2007 = vmatprep.subr.bf16.mxu0 %v5449_v62  ;;  %2050 = vmatprep.subr.bf16.mxu1 %v5452_v63  ;;  %v6519_v62 = vcombine.low %v6491_v43, %v6493_v44  ;;  %v5527_v63 = vld [vmem:[#allocation5 + $0x4c4] ss:$16 sps:$4 sm:$0xff]   ;;  %v5531_v44 = vld [vmem:[#allocation5 + $0x4a0] ss:$16 sps:$4 sm:$0xff]  }
  0xdf   :  { %v5536_v43 = vld [vmem:[#allocation5 + $0x6a4] ss:$16 sps:$4 sm:$0xff]  }
  0xe1   :  { %2008 = vmatpush1.bf16.msra.mxu0 %v5447_v0  ;;  %2051 = vmatpush1.bf16.msra.mxu1 %v5450_v1  ;;  %v5530_v0 = vld [vmem:[#allocation5 + $0x6c4] ss:$16 sps:$4 sm:$0xff]   ;;  %v5525_v1 = vld [vmem:[#allocation5 + $0x4c0] ss:$16 sps:$4 sm:$0xff]  }
  0xe2   :  { %2009 = vmatprep.subr.bf16.mxu0 %v5455_v2  ;;  %2052 = vmatprep.subr.bf16.mxu1 %v5458_v3  ;;  %v5528_v2 = vld [vmem:[#allocation5 + $0x6c0] ss:$16 sps:$4 sm:$0xff]   ;;  %v6523_v3 = vcombine.high %v6505_v55, %v6507_v56 }
  0xe5   :  { %2010 = vmatpush1.bf16.msra.mxu0 %v5453_v4  ;;  %2053 = vmatpush1.bf16.msra.mxu1 %v5456_v5  ;;  %v5534_v4 = vld [vmem:[#allocation5 + $0x6a0] ss:$16 sps:$4 sm:$0xff]   ;;  %v5539_v5 = vld [vmem:[#allocation5 + $0x484] ss:$16 sps:$4 sm:$0xff]  }
  0xe6   :  { %2011 = vmatprep.subr.bf16.mxu0 %v5461_v6  ;;  %2054 = vmatprep.subr.bf16.mxu1 %v5464_v7  ;;  %v5542_v6 = vld [vmem:[#allocation5 + $0x684] ss:$16 sps:$4 sm:$0xff]   ;;  %v5537_v7 = vld [vmem:[#allocation5 + $0x480] ss:$16 sps:$4 sm:$0xff]  }
  0xe9   :  { %2012 = vmatpush1.bf16.msra.mxu0 %v5459_v8  ;;  %2055 = vmatpush1.bf16.msra.mxu1 %v5462_v9  ;;  %v5540_v8 = vld [vmem:[#allocation5 + $0x680] ss:$16 sps:$4 sm:$0xff]   ;;  %v5545_v9 = vld [vmem:[#allocation5 + $0x464] ss:$16 sps:$4 sm:$0xff]  }
  0xea   :  { %2013 = vmatprep.subr.bf16.mxu0 %v5467_v10  ;;  %2056 = vmatprep.subr.bf16.mxu1 %v5470_v11  ;;  %v5548_v10 = vld [vmem:[#allocation5 + $0x664] ss:$16 sps:$4 sm:$0xff]   ;;  %v5543_v11 = vld [vmem:[#allocation5 + $0x460] ss:$16 sps:$4 sm:$0xff]  }
  0xed   :  { %2014 = vmatpush1.bf16.msra.mxu0 %v5465_v12  ;;  %2057 = vmatpush1.bf16.msra.mxu1 %v5468_v13  ;;  %v5546_v12 = vld [vmem:[#allocation5 + $0x660] ss:$16 sps:$4 sm:$0xff]   ;;  %v5551_v13 = vld [vmem:[#allocation5 + $0x444] ss:$16 sps:$4 sm:$0xff]  }
  0xee   :  { %2015 = vmatprep.subr.bf16.mxu0 %v5473_v14  ;;  %2058 = vmatprep.subr.bf16.mxu1 %v5476_v15  ;;  %v5554_v14 = vld [vmem:[#allocation5 + $0x644] ss:$16 sps:$4 sm:$0xff]   ;;  %v5549_v15 = vld [vmem:[#allocation5 + $0x440] ss:$16 sps:$4 sm:$0xff]  }
  0xf1   :  { %2016 = vmatpush2.bf16.msra.mxu0 %v5471_v16  ;;  %2059 = vmatpush2.bf16.msra.mxu1 %v5474_v17  ;;  %v5552_v16 = vld [vmem:[#allocation5 + $0x640] ss:$16 sps:$4 sm:$0xff]   ;;  %v5557_v17 = vld [vmem:[#allocation5 + $0x424] ss:$16 sps:$4 sm:$0xff]  }
  0xf2   :  { %2017 = vmatprep.subr.bf16.mxu0 %v5479_v18  ;;  %2060 = vmatprep.subr.bf16.mxu1 %v5482_v19  ;;  %v5560_v18 = vld [vmem:[#allocation5 + $0x624] ss:$16 sps:$4 sm:$0xff]   ;;  %v5555_v19 = vld [vmem:[#allocation5 + $0x420] ss:$16 sps:$4 sm:$0xff]  }
  0xf5   :  { %2018 = vmatpush2.bf16.msra.mxu0 %v5477_v20  ;;  %2061 = vmatpush2.bf16.msra.mxu1 %v5480_v21  ;;  %v5558_v20 = vld [vmem:[#allocation5 + $0x620] ss:$16 sps:$4 sm:$0xff]   ;;  %v5563_v21 = vld [vmem:[#allocation5 + $0x404] ss:$16 sps:$4 sm:$0xff]  }
  0xf6   :  { %2019 = vmatprep.subr.bf16.mxu0 %v5485_v22  ;;  %2062 = vmatprep.subr.bf16.mxu1 %v5488_v23  ;;  %v5566_v22 = vld [vmem:[#allocation5 + $0x604] ss:$16 sps:$4 sm:$0xff]   ;;  %v5561_v23 = vld [vmem:[#allocation5 + $0x400] ss:$16 sps:$4 sm:$0xff]  }
  0xf9   :  { %2020 = vmatpush2.bf16.msra.mxu0 %v5483_v24  ;;  %2063 = vmatpush2.bf16.msra.mxu1 %v5486_v25  ;;  %v5564_v24 = vld [vmem:[#allocation5 + $0x600] ss:$16 sps:$4 sm:$0xff]   ;;  %v5569_v25 = vld [vmem:[#allocation5 + $0x5e4] ss:$16 sps:$4 sm:$0xff]  }
  0xfa   :  { %2021 = vmatprep.subr.bf16.mxu0 %v5491_v26  ;;  %2064 = vmatprep.subr.bf16.mxu1 %v5494_v27  ;;  %v5572_v26 = vld [vmem:[#allocation5 + $0x7e4] ss:$16 sps:$4 sm:$0xff]   ;;  %v5567_v27 = vld [vmem:[#allocation5 + $0x5e0] ss:$16 sps:$4 sm:$0xff]  }
  0xfd   :  { %2022 = vmatpush2.bf16.msra.mxu0 %v5489_v28  ;;  %2065 = vmatpush2.bf16.msra.mxu1 %v5492_v29  ;;  %v5570_v28 = vld [vmem:[#allocation5 + $0x7e0] ss:$16 sps:$4 sm:$0xff]   ;;  %v5575_v29 = vld [vmem:[#allocation5 + $0x5c4] ss:$16 sps:$4 sm:$0xff]  }
  0xfe   :  { %2023 = vmatprep.subr.bf16.mxu0 %v5497_v30  ;;  %2066 = vmatprep.subr.bf16.mxu1 %v5500_v31  ;;  %v5578_v30 = vld [vmem:[#allocation5 + $0x7c4] ss:$16 sps:$4 sm:$0xff]   ;;  %v5573_v31 = vld [vmem:[#allocation5 + $0x5c0] ss:$16 sps:$4 sm:$0xff]  }
 0x101   :  { %2024 = vmatpush2.bf16.msra.mxu0 %v5495_v32  ;;  %2067 = vmatpush2.bf16.msra.mxu1 %v5498_v33  ;;  %v5576_v32 = vld [vmem:[#allocation5 + $0x7c0] ss:$16 sps:$4 sm:$0xff]   ;;  %v5581_v33 = vld [vmem:[#allocation5 + $0x5a4] ss:$16 sps:$4 sm:$0xff]  }
 0x102   :  { %2025 = vmatprep.subr.bf16.mxu0 %v5503_v34  ;;  %2068 = vmatprep.subr.bf16.mxu1 %v5506_v35  ;;  %v5584_v34 = vld [vmem:[#allocation5 + $0x7a4] ss:$16 sps:$4 sm:$0xff]   ;;  %v5579_v35 = vld [vmem:[#allocation5 + $0x5a0] ss:$16 sps:$4 sm:$0xff]  }
 0x105   :  { %2026 = vmatpush2.bf16.msra.mxu0 %v5501_v36  ;;  %2069 = vmatpush2.bf16.msra.mxu1 %v5504_v38  ;;  %v5582_v36 = vld [vmem:[#allocation5 + $0x7a0] ss:$16 sps:$4 sm:$0xff]   ;;  %v5587_v38 = vld [vmem:[#allocation5 + $0x584] ss:$16 sps:$4 sm:$0xff]  }
 0x106   :  { %2027 = vmatprep.subr.bf16.mxu0 %v5509_v39  ;;  %2070 = vmatprep.subr.bf16.mxu1 %v5512_v41  ;;  %v5590_v39 = vld [vmem:[#allocation5 + $0x784] ss:$16 sps:$4 sm:$0xff]   ;;  %v5585_v41 = vld [vmem:[#allocation5 + $0x580] ss:$16 sps:$4 sm:$0xff]  }
 0x109   :  { %2028 = vmatpush2.bf16.msra.mxu0 %v5507_v45  ;;  %2071 = vmatpush2.bf16.msra.mxu1 %v5510_v46  ;;  %v5588_v45 = vld [vmem:[#allocation5 + $0x780] ss:$16 sps:$4 sm:$0xff]   ;;  %v5593_v46 = vld [vmem:[#allocation5 + $0x564] ss:$16 sps:$4 sm:$0xff]  }
 0x10a   :  { %2029 = vmatprep.subr.bf16.mxu0 %v5515_v47  ;;  %2072 = vmatprep.subr.bf16.mxu1 %v5518_v48  ;;  %v5596_v47 = vld [vmem:[#allocation5 + $0x764] ss:$16 sps:$4 sm:$0xff]   ;;  %v5591_v48 = vld [vmem:[#allocation5 + $0x560] ss:$16 sps:$4 sm:$0xff]  }
 0x10d   :  { %2030 = vmatpush2.bf16.msra.mxu0 %v5513_v51  ;;  %2073 = vmatpush2.bf16.msra.mxu1 %v5516_v52  ;;  %v5594_v51 = vld [vmem:[#allocation5 + $0x760] ss:$16 sps:$4 sm:$0xff]   ;;  %v5599_v52 = vld [vmem:[#allocation5 + $0x544] ss:$16 sps:$4 sm:$0xff]  }
 0x10e   :  { %2085 = vmatprep.subr.bf16.mxu0 %v5521_v53  ;;  %2128 = vmatprep.subr.bf16.mxu1 %v5524_v54  ;;  %v5602_v53 = vld [vmem:[#allocation5 + $0x744] ss:$16 sps:$4 sm:$0xff]   ;;  %v5597_v54 = vld [vmem:[#allocation5 + $0x540] ss:$16 sps:$4 sm:$0xff]  }
 0x110   :  { %2032 = vmatmul.mubr.bf16.vlgmr.msra.gmra.mxu0 %v6515_v61  ;;  %2075 = vmatmul.mubr.bf16.vlgmr.msra.gmra.mxu1 %v6519_v62 }
 0x111   :  { %2086 = vmatpush1.bf16.msra.mxu0 %v5519_v59  ;;  %2129 = vmatpush1.bf16.msra.mxu1 %v5522_v60  ;;  %v5600_v59 = vld [vmem:[#allocation5 + $0x740] ss:$16 sps:$4 sm:$0xff]   ;;  %v5605_v60 = vld [vmem:[#allocation5 + $0x524] ss:$16 sps:$4 sm:$0xff]  }
 0x112   :  { %2087 = vmatprep.subr.bf16.mxu0 %v5527_v63  ;;  %2130 = vmatprep.subr.bf16.mxu1 %v5530_v0  ;;  %v5608_v63 = vld [vmem:[#allocation5 + $0x724] ss:$16 sps:$4 sm:$0xff]   ;;  %v5603_v0 = vld [vmem:[#allocation5 + $0x520] ss:$16 sps:$4 sm:$0xff]  }
 0x113   :  { %2117 = vmatprep.mubr.bf16.mxu0 %v6523_v3  ;;  %2160 = vmatprep.mubr.bf16.mxu1 %v6527_v40 }
 0x115   :  { %2088 = vmatpush1.bf16.msra.mxu0 %v5525_v1  ;;  %2131 = vmatpush1.bf16.msra.mxu1 %v5528_v2  ;;  %v5606_v1 = vld [vmem:[#allocation5 + $0x720] ss:$16 sps:$4 sm:$0xff]   ;;  %v5611_v2 = vld [vmem:[#allocation5 + $0x504] ss:$16 sps:$4 sm:$0xff]  }
 0x116   :  { %2089 = vmatprep.subr.bf16.mxu0 %v5533_v42  ;;  %2132 = vmatprep.subr.bf16.mxu1 %v5536_v43  ;;  %v5614_v42 = vld [vmem:[#allocation5 + $0x704] ss:$16 sps:$4 sm:$0xff]   ;;  %v5609_v43 = vld [vmem:[#allocation5 + $0x500] ss:$16 sps:$4 sm:$0xff]  }
 0x119   :  { %2090 = vmatpush1.bf16.msra.mxu0 %v5531_v44  ;;  %2133 = vmatpush1.bf16.msra.mxu1 %v5534_v4  ;;  %v5612_v44 = vld [vmem:[#allocation5 + $0x700] ss:$16 sps:$4 sm:$0xff]   ;;  %v5617_v4 = vld [vmem:[#allocation5 + $0xec] ss:$16 sps:$4 sm:$0xff]  }
 0x11a   :  { %2091 = vmatprep.subr.bf16.mxu0 %v5539_v5  ;;  %2134 = vmatprep.subr.bf16.mxu1 %v5542_v6  ;;  %v5620_v5 = vld [vmem:[#allocation5 + $0x2ec] ss:$16 sps:$4 sm:$0xff]   ;;  %v5615_v6 = vld [vmem:[#allocation5 + $0xe8] ss:$16 sps:$4 sm:$0xff]  }
 0x11d   :  { %2092 = vmatpush1.bf16.msra.mxu0 %v5537_v7  ;;  %2135 = vmatpush1.bf16.msra.mxu1 %v5540_v8  ;;  %v5618_v7 = vld [vmem:[#allocation5 + $0x2e8] ss:$16 sps:$4 sm:$0xff]   ;;  %v6535_v8 = vcombine.low %v6505_v55, %v6507_v56 }
 0x11e   :  { %2093 = vmatprep.subr.bf16.mxu0 %v5545_v9  ;;  %2136 = vmatprep.subr.bf16.mxu1 %v5548_v10  ;;  %v6539_v9 = vcombine.low %v6509_v57, %v6511_v58  ;;  %v5623_v10 = vld [vmem:[#allocation5 + $0xcc] ss:$16 sps:$4 sm:$0xff]   ;;  %v5627_v55 = vld [vmem:[#allocation5 + $0xa8] ss:$16 sps:$4 sm:$0xff]  }
 0x11f   :  { %v5630_v56 = vld [vmem:[#allocation5 + $0x2a8] ss:$16 sps:$4 sm:$0xff]   ;;  %v5635_v57 = vld [vmem:[#allocation5 + $0x8c] ss:$16 sps:$4 sm:$0xff]  }
 0x120   :  { %v5638_v58 = vld [vmem:[#allocation5 + $0x28c] ss:$16 sps:$4 sm:$0xff]  }
 0x121   :  { %2094 = vmatpush1.bf16.msra.mxu0 %v5543_v11  ;;  %2137 = vmatpush1.bf16.msra.mxu1 %v5546_v12  ;;  %v5626_v11 = vld [vmem:[#allocation5 + $0x2cc] ss:$16 sps:$4 sm:$0xff]   ;;  %v5621_v12 = vld [vmem:[#allocation5 + $0xc8] ss:$16 sps:$4 sm:$0xff]  }
 0x122   :  { %2095 = vmatprep.subr.bf16.mxu0 %v5551_v13  ;;  %2138 = vmatprep.subr.bf16.mxu1 %v5554_v14  ;;  %v5624_v13 = vld [vmem:[#allocation5 + $0x2c8] ss:$16 sps:$4 sm:$0xff]   ;;  %v5629_v14 = vld [vmem:[#allocation5 + $0xac] ss:$16 sps:$4 sm:$0xff]  }
 0x125   :  { %2096 = vmatpush1.bf16.msra.mxu0 %v5549_v15  ;;  %2139 = vmatpush1.bf16.msra.mxu1 %v5552_v16  ;;  %v5632_v15 = vld [vmem:[#allocation5 + $0x2ac] ss:$16 sps:$4 sm:$0xff]   ;;  %v5633_v16 = vld [vmem:[#allocation5 + $0x88] ss:$16 sps:$4 sm:$0xff]  }
 0x126   :  { %2097 = vmatprep.subr.bf16.mxu0 %v5557_v17  ;;  %2140 = vmatprep.subr.bf16.mxu1 %v5560_v18  ;;  %v5636_v17 = vld [vmem:[#allocation5 + $0x288] ss:$16 sps:$4 sm:$0xff]   ;;  %v5641_v18 = vld [vmem:[#allocation5 + $0x6c] ss:$16 sps:$4 sm:$0xff]  }
 0x129   :  { %2098 = vmatpush1.bf16.msra.mxu0 %v5555_v19  ;;  %2141 = vmatpush1.bf16.msra.mxu1 %v5558_v20  ;;  %v5644_v19 = vld [vmem:[#allocation5 + $0x26c] ss:$16 sps:$4 sm:$0xff]   ;;  %v5639_v20 = vld [vmem:[#allocation5 + $0x68] ss:$16 sps:$4 sm:$0xff]  }
 0x12a   :  { %2099 = vmatprep.subr.bf16.mxu0 %v5563_v21  ;;  %2142 = vmatprep.subr.bf16.mxu1 %v5566_v22  ;;  %v5642_v21 = vld [vmem:[#allocation5 + $0x268] ss:$16 sps:$4 sm:$0xff]  }
 0x12b   :  { %v5645_v22 = vld [vmem:[#allocation5 + $0x48] ss:$16 sps:$4 sm:$0xff]  }
 0x12d   :  { %2100 = vmatpush1.bf16.msra.mxu0 %v5561_v23  ;;  %2143 = vmatpush1.bf16.msra.mxu1 %v5564_v24  ;;  %v5648_v23 = vld [vmem:[#allocation5 + $0x248] ss:$16 sps:$4 sm:$0xff]   ;;  %v5653_v24 = vld [vmem:[#allocation5 + $0x2c] ss:$16 sps:$4 sm:$0xff]  }
 0x12e   :  { %2101 = vmatprep.subr.bf16.mxu0 %v5569_v25  ;;  %2144 = vmatprep.subr.bf16.mxu1 %v5572_v26  ;;  %v5656_v25 = vld [vmem:[#allocation5 + $0x22c] ss:$16 sps:$4 sm:$0xff]   ;;  %v5651_v26 = vld [vmem:[#allocation5 + $0x28] ss:$16 sps:$4 sm:$0xff]  }
 0x131   :  { %2102 = vmatpush2.bf16.msra.mxu0 %v5567_v27  ;;  %2145 = vmatpush2.bf16.msra.mxu1 %v5570_v28  ;;  %v5654_v27 = vld [vmem:[#allocation5 + $0x228] ss:$16 sps:$4 sm:$0xff]   ;;  %v5659_v28 = vld [vmem:[#allocation5 + $0xc] ss:$16 sps:$4 sm:$0xff]  }
 0x132   :  { %2103 = vmatprep.subr.bf16.mxu0 %v5575_v29  ;;  %2146 = vmatprep.subr.bf16.mxu1 %v5578_v30  ;;  %v5662_v29 = vld [vmem:[#allocation5 + $0x20c] ss:$16 sps:$4 sm:$0xff]   ;;  %v5657_v30 = vld [vmem:[#allocation5 + $0x8] ss:$16 sps:$4 sm:$0xff]  }
 0x135   :  { %2104 = vmatpush2.bf16.msra.mxu0 %v5573_v31  ;;  %2147 = vmatpush2.bf16.msra.mxu1 %v5576_v32  ;;  %v5660_v31 = vld [vmem:[#allocation5 + $0x208] ss:$16 sps:$4 sm:$0xff]   ;;  %v5665_v32 = vld [vmem:[#allocation5 + $0x1ec] ss:$16 sps:$4 sm:$0xff]  }
 0x136   :  { %2105 = vmatprep.subr.bf16.mxu0 %v5581_v33  ;;  %2148 = vmatprep.subr.bf16.mxu1 %v5584_v34  ;;  %v5668_v33 = vld [vmem:[#allocation5 + $0x3ec] ss:$16 sps:$4 sm:$0xff]   ;;  %v5663_v34 = vld [vmem:[#allocation5 + $0x1e8] ss:$16 sps:$4 sm:$0xff]  }
 0x139   :  { %2106 = vmatpush2.bf16.msra.mxu0 %v5579_v35  ;;  %2149 = vmatpush2.bf16.msra.mxu1 %v5582_v36  ;;  %v5666_v35 = vld [vmem:[#allocation5 + $0x3e8] ss:$16 sps:$4 sm:$0xff]   ;;  %v5671_v36 = vld [vmem:[#allocation5 + $0x1cc] ss:$16 sps:$4 sm:$0xff]  }
 0x13a   :  { %2107 = vmatprep.subr.bf16.mxu0 %v5587_v38  ;;  %2150 = vmatprep.subr.bf16.mxu1 %v5590_v39  ;;  %v5674_v38 = vld [vmem:[#allocation5 + $0x3cc] ss:$16 sps:$4 sm:$0xff]   ;;  %v5669_v39 = vld [vmem:[#allocation5 + $0x1c8] ss:$16 sps:$4 sm:$0xff]  }
 0x13d   :  { %2108 = vmatpush2.bf16.msra.mxu0 %v5585_v41  ;;  %2151 = vmatpush2.bf16.msra.mxu1 %v5588_v45  ;;  %v5672_v41 = vld [vmem:[#allocation5 + $0x3c8] ss:$16 sps:$4 sm:$0xff]   ;;  %v5677_v45 = vld [vmem:[#allocation5 + $0x1ac] ss:$16 sps:$4 sm:$0xff]  }
 0x13e   :  { %2109 = vmatprep.subr.bf16.mxu0 %v5593_v46  ;;  %2152 = vmatprep.subr.bf16.mxu1 %v5596_v47  ;;  %v5680_v46 = vld [vmem:[#allocation5 + $0x3ac] ss:$16 sps:$4 sm:$0xff]   ;;  %v5675_v47 = vld [vmem:[#allocation5 + $0x1a8] ss:$16 sps:$4 sm:$0xff]  }
 0x141   :  { %2110 = vmatpush2.bf16.msra.mxu0 %v5591_v48  ;;  %2153 = vmatpush2.bf16.msra.mxu1 %v5594_v51  ;;  %v5678_v48 = vld [vmem:[#allocation5 + $0x3a8] ss:$16 sps:$4 sm:$0xff]   ;;  %v5683_v51 = vld [vmem:[#allocation5 + $0x18c] ss:$16 sps:$4 sm:$0xff]  }
 0x142   :  { %2111 = vmatprep.subr.bf16.mxu0 %v5599_v52  ;;  %2154 = vmatprep.subr.bf16.mxu1 %v5602_v53  ;;  %v5686_v52 = vld [vmem:[#allocation5 + $0x38c] ss:$16 sps:$4 sm:$0xff]   ;;  %v5681_v53 = vld [vmem:[#allocation5 + $0x188] ss:$16 sps:$4 sm:$0xff]  }
 0x145   :  { %2112 = vmatpush2.bf16.msra.mxu0 %v5597_v54  ;;  %2155 = vmatpush2.bf16.msra.mxu1 %v5600_v59  ;;  %v5684_v54 = vld [vmem:[#allocation5 + $0x388] ss:$16 sps:$4 sm:$0xff]   ;;  %v5689_v59 = vld [vmem:[#allocation5 + $0x16c] ss:$16 sps:$4 sm:$0xff]  }
 0x146   :  { %2113 = vmatprep.subr.bf16.mxu0 %v5605_v60  ;;  %2156 = vmatprep.subr.bf16.mxu1 %v5608_v63  ;;  %v5692_v60 = vld [vmem:[#allocation5 + $0x36c] ss:$16 sps:$4 sm:$0xff]   ;;  %v5687_v63 = vld [vmem:[#allocation5 + $0x168] ss:$16 sps:$4 sm:$0xff]  }
 0x149   :  { %2114 = vmatpush2.bf16.msra.mxu0 %v5603_v0  ;;  %2157 = vmatpush2.bf16.msra.mxu1 %v5606_v1  ;;  %v5690_v0 = vld [vmem:[#allocation5 + $0x368] ss:$16 sps:$4 sm:$0xff]   ;;  %v5695_v1 = vld [vmem:[#allocation5 + $0x14c] ss:$16 sps:$4 sm:$0xff]  }
 0x14a   :  { %2115 = vmatprep.subr.bf16.mxu0 %v5611_v2  ;;  %2158 = vmatprep.subr.bf16.mxu1 %v5614_v42  ;;  %v5698_v2 = vld [vmem:[#allocation5 + $0x34c] ss:$16 sps:$4 sm:$0xff]   ;;  %v5693_v42 = vld [vmem:[#allocation5 + $0x148] ss:$16 sps:$4 sm:$0xff]  }
 0x14d   :  { %2116 = vmatpush2.bf16.msra.mxu0 %v5609_v43  ;;  %2159 = vmatpush2.bf16.msra.mxu1 %v5612_v44  ;;  %v5696_v43 = vld [vmem:[#allocation5 + $0x348] ss:$16 sps:$4 sm:$0xff]   ;;  %v5701_v44 = vld [vmem:[#allocation5 + $0x12c] ss:$16 sps:$4 sm:$0xff]  }
 0x14e   :  { %2171 = vmatprep.subr.bf16.mxu0 %v5617_v4  ;;  %2214 = vmatprep.subr.bf16.mxu1 %v5620_v5  ;;  %v5704_v4 = vld [vmem:[#allocation5 + $0x32c] ss:$16 sps:$4 sm:$0xff]   ;;  %v5699_v5 = vld [vmem:[#allocation5 + $0x128] ss:$16 sps:$4 sm:$0xff]  }
 0x150   :  { %2118 = vmatmul.mubr.bf16.vlgmr.msra.gmra.mxu0 %v6535_v8  ;;  %2161 = vmatmul.mubr.bf16.vlgmr.msra.gmra.mxu1 %v6539_v9 }
 0x151   :  { %2172 = vmatpush1.bf16.msra.mxu0 %v5615_v6  ;;  %2215 = vmatpush1.bf16.msra.mxu1 %v5618_v7  ;;  %v5702_v6 = vld [vmem:[#allocation5 + $0x328] ss:$16 sps:$4 sm:$0xff]   ;;  %v5707_v7 = vld [vmem:[#allocation5 + $0x10c] ss:$16 sps:$4 sm:$0xff]  }
 0x152   :  { %2173 = vmatprep.subr.bf16.mxu0 %v5623_v10  ;;  %2216 = vmatprep.subr.bf16.mxu1 %v5626_v11  ;;  %v5710_v10 = vld [vmem:[#allocation5 + $0x30c] ss:$16 sps:$4 sm:$0xff]   ;;  %v5705_v11 = vld [vmem:[#allocation5 + $0x108] ss:$16 sps:$4 sm:$0xff]  }
 0x153   :  { %2203 = vmatprep.mubr.bf16.mxu0 %v6497_v49  ;;  %2246 = vmatprep.mubr.bf16.mxu1 %v6501_v50  ;;  %v5647_v49 = vld [vmem:[#allocation5 + $0x4c] ss:$16 sps:$4 sm:$0xff]  }
 0x154   :  { %v5650_v50 = vld [vmem:[#allocation5 + $0x24c] ss:$16 sps:$4 sm:$0xff]  }
 0x155   :  { %2174 = vmatpush1.bf16.msra.mxu0 %v5621_v12  ;;  %2217 = vmatpush1.bf16.msra.mxu1 %v5624_v13  ;;  %v5708_v12 = vld [vmem:[#allocation5 + $0x308] ss:$16 sps:$4 sm:$0xff]   ;;  %v5713_v13 = vld [vmem:[#allocation5 + $0x4ec] ss:$16 sps:$4 sm:$0xff]  }
 0x156   :  { %2175 = vmatprep.subr.bf16.mxu0 %v5629_v14  ;;  %2218 = vmatprep.subr.bf16.mxu1 %v5632_v15  ;;  %v5716_v14 = vld [vmem:[#allocation5 + $0x6ec] ss:$16 sps:$4 sm:$0xff]   ;;  %v5711_v15 = vld [vmem:[#allocation5 + $0x4e8] ss:$16 sps:$4 sm:$0xff]  }
 0x159   :  { %2176 = vmatpush1.bf16.msra.mxu0 %v5627_v55  ;;  %2219 = vmatpush1.bf16.msra.mxu1 %v5630_v56  ;;  %v5714_v55 = vld [vmem:[#allocation5 + $0x6e8] ss:$16 sps:$4 sm:$0xff]   ;;  %v5719_v56 = vld [vmem:[#allocation5 + $0x4cc] ss:$16 sps:$4 sm:$0xff]  }
 0x15a   :  { %2177 = vmatprep.subr.bf16.mxu0 %v5635_v57  ;;  %2220 = vmatprep.subr.bf16.mxu1 %v5638_v58  ;;  %v5722_v57 = vld [vmem:[#allocation5 + $0x6cc] ss:$16 sps:$4 sm:$0xff]   ;;  %v5717_v58 = vld [vmem:[#allocation5 + $0x4c8] ss:$16 sps:$4 sm:$0xff]  }
 0x15d   :  { %2178 = vmatpush1.bf16.msra.mxu0 %v5633_v16  ;;  %2221 = vmatpush1.bf16.msra.mxu1 %v5636_v17  ;;  %v5720_v16 = vld [vmem:[#allocation5 + $0x6c8] ss:$16 sps:$4 sm:$0xff]   ;;  %v5725_v17 = vld [vmem:[#allocation5 + $0x4ac] ss:$16 sps:$4 sm:$0xff]  }
 0x15e   :  { %2179 = vmatprep.subr.bf16.mxu0 %v5641_v18  ;;  %2222 = vmatprep.subr.bf16.mxu1 %v5644_v19  ;;  %v5728_v18 = vld [vmem:[#allocation5 + $0x6ac] ss:$16 sps:$4 sm:$0xff]   ;;  %v5723_v19 = vld [vmem:[#allocation5 + $0x4a8] ss:$16 sps:$4 sm:$0xff]  }
 0x161   :  { %2180 = vmatpush1.bf16.msra.mxu0 %v5639_v20  ;;  %2223 = vmatpush1.bf16.msra.mxu1 %v5642_v21  ;;  %v5726_v20 = vld [vmem:[#allocation5 + $0x6a8] ss:$16 sps:$4 sm:$0xff]  }
 0x162   :  { %2181 = vmatprep.subr.bf16.mxu0 %v5647_v49  ;;  %2224 = vmatprep.subr.bf16.mxu1 %v5650_v50  ;;  %v5729_v21 = vld [vmem:[#allocation5 + $0x488] ss:$16 sps:$4 sm:$0xff]   ;;  %v5737_v50 = vld [vmem:[#allocation5 + $0x46c] ss:$16 sps:$4 sm:$0xff]  }
 0x163   :  { %v5732_v49 = vld [vmem:[#allocation5 + $0x688] ss:$16 sps:$4 sm:$0xff]  }
 0x165   :  { %2182 = vmatpush1.bf16.msra.mxu0 %v5645_v22  ;;  %2225 = vmatpush1.bf16.msra.mxu1 %v5648_v23  ;;  %v5740_v22 = vld [vmem:[#allocation5 + $0x66c] ss:$16 sps:$4 sm:$0xff]  }
 0x166   :  { %2183 = vmatprep.subr.bf16.mxu0 %v5653_v24  ;;  %2226 = vmatprep.subr.bf16.mxu1 %v5656_v25  ;;  %v5743_v23 = vld [vmem:[#allocation5 + $0x44c] ss:$16 sps:$4 sm:$0xff]   ;;  %v5741_v25 = vld [vmem:[#allocation5 + $0x448] ss:$16 sps:$4 sm:$0xff]  }
 0x167   :  { %v5746_v24 = vld [vmem:[#allocation5 + $0x64c] ss:$16 sps:$4 sm:$0xff]  }
 0x169   :  { %2184 = vmatpush1.bf16.msra.mxu0 %v5651_v26  ;;  %2227 = vmatpush1.bf16.msra.mxu1 %v5654_v27  ;;  %v5744_v26 = vld [vmem:[#allocation5 + $0x648] ss:$16 sps:$4 sm:$0xff]   ;;  %v5749_v27 = vld [vmem:[#allocation5 + $0x42c] ss:$16 sps:$4 sm:$0xff]  }
 0x16a   :  { %2185 = vmatprep.subr.bf16.mxu0 %v5659_v28  ;;  %2228 = vmatprep.subr.bf16.mxu1 %v5662_v29  ;;  %v5752_v28 = vld [vmem:[#allocation5 + $0x62c] ss:$16 sps:$4 sm:$0xff]   ;;  %v5747_v29 = vld [vmem:[#allocation5 + $0x428] ss:$16 sps:$4 sm:$0xff]  }
 0x16d   :  { %2186 = vmatpush1.bf16.msra.mxu0 %v5657_v30  ;;  %2229 = vmatpush1.bf16.msra.mxu1 %v5660_v31  ;;  %v5750_v30 = vld [vmem:[#allocation5 + $0x628] ss:$16 sps:$4 sm:$0xff]   ;;  %v5755_v31 = vld [vmem:[#allocation5 + $0x40c] ss:$16 sps:$4 sm:$0xff]  }
 0x16e   :  { %2187 = vmatprep.subr.bf16.mxu0 %v5665_v32  ;;  %2230 = vmatprep.subr.bf16.mxu1 %v5668_v33  ;;  %v5758_v32 = vld [vmem:[#allocation5 + $0x60c] ss:$16 sps:$4 sm:$0xff]   ;;  %v5753_v33 = vld [vmem:[#allocation5 + $0x408] ss:$16 sps:$4 sm:$0xff]  }
 0x171   :  { %2188 = vmatpush2.bf16.msra.mxu0 %v5663_v34  ;;  %2231 = vmatpush2.bf16.msra.mxu1 %v5666_v35  ;;  %v5756_v34 = vld [vmem:[#allocation5 + $0x608] ss:$16 sps:$4 sm:$0xff]   ;;  %v5761_v35 = vld [vmem:[#allocation5 + $0x5ec] ss:$16 sps:$4 sm:$0xff]  }
 0x172   :  { %2189 = vmatprep.subr.bf16.mxu0 %v5671_v36  ;;  %2232 = vmatprep.subr.bf16.mxu1 %v5674_v38  ;;  %v5764_v36 = vld [vmem:[#allocation5 + $0x7ec] ss:$16 sps:$4 sm:$0xff]   ;;  %v5759_v38 = vld [vmem:[#allocation5 + $0x5e8] ss:$16 sps:$4 sm:$0xff]  }
 0x175   :  { %2190 = vmatpush2.bf16.msra.mxu0 %v5669_v39  ;;  %2233 = vmatpush2.bf16.msra.mxu1 %v5672_v41  ;;  %v5762_v39 = vld [vmem:[#allocation5 + $0x7e8] ss:$16 sps:$4 sm:$0xff]   ;;  %v5767_v41 = vld [vmem:[#allocation5 + $0x5cc] ss:$16 sps:$4 sm:$0xff]  }
 0x176   :  { %2191 = vmatprep.subr.bf16.mxu0 %v5677_v45  ;;  %2234 = vmatprep.subr.bf16.mxu1 %v5680_v46  ;;  %v5770_v45 = vld [vmem:[#allocation5 + $0x7cc] ss:$16 sps:$4 sm:$0xff]   ;;  %v5765_v46 = vld [vmem:[#allocation5 + $0x5c8] ss:$16 sps:$4 sm:$0xff]  }
 0x179   :  { %2192 = vmatpush2.bf16.msra.mxu0 %v5675_v47  ;;  %2235 = vmatpush2.bf16.msra.mxu1 %v5678_v48  ;;  %v5768_v47 = vld [vmem:[#allocation5 + $0x7c8] ss:$16 sps:$4 sm:$0xff]   ;;  %v5773_v48 = vld [vmem:[#allocation5 + $0x5ac] ss:$16 sps:$4 sm:$0xff]  }
 0x17a   :  { %2193 = vmatprep.subr.bf16.mxu0 %v5683_v51  ;;  %2236 = vmatprep.subr.bf16.mxu1 %v5686_v52  ;;  %v5776_v51 = vld [vmem:[#allocation5 + $0x7ac] ss:$16 sps:$4 sm:$0xff]   ;;  %v5771_v52 = vld [vmem:[#allocation5 + $0x5a8] ss:$16 sps:$4 sm:$0xff]  }
 0x17d   :  { %2194 = vmatpush2.bf16.msra.mxu0 %v5681_v53  ;;  %2237 = vmatpush2.bf16.msra.mxu1 %v5684_v54  ;;  %v5774_v53 = vld [vmem:[#allocation5 + $0x7a8] ss:$16 sps:$4 sm:$0xff]   ;;  %v5779_v54 = vld [vmem:[#allocation5 + $0x58c] ss:$16 sps:$4 sm:$0xff]  }
 0x17e   :  { %2195 = vmatprep.subr.bf16.mxu0 %v5689_v59  ;;  %2238 = vmatprep.subr.bf16.mxu1 %v5692_v60  ;;  %v5782_v59 = vld [vmem:[#allocation5 + $0x78c] ss:$16 sps:$4 sm:$0xff]   ;;  %v5777_v60 = vld [vmem:[#allocation5 + $0x588] ss:$16 sps:$4 sm:$0xff]  }
 0x181   :  { %2196 = vmatpush2.bf16.msra.mxu0 %v5687_v63  ;;  %2239 = vmatpush2.bf16.msra.mxu1 %v5690_v0  ;;  %v5780_v63 = vld [vmem:[#allocation5 + $0x788] ss:$16 sps:$4 sm:$0xff]   ;;  %v5785_v0 = vld [vmem:[#allocation5 + $0x56c] ss:$16 sps:$4 sm:$0xff]  }
 0x182   :  { %2197 = vmatprep.subr.bf16.mxu0 %v5695_v1  ;;  %2240 = vmatprep.subr.bf16.mxu1 %v5698_v2  ;;  %v5788_v1 = vld [vmem:[#allocation5 + $0x76c] ss:$16 sps:$4 sm:$0xff]   ;;  %v5783_v2 = vld [vmem:[#allocation5 + $0x568] ss:$16 sps:$4 sm:$0xff]  }
 0x185   :  { %2198 = vmatpush2.bf16.msra.mxu0 %v5693_v42  ;;  %2241 = vmatpush2.bf16.msra.mxu1 %v5696_v43  ;;  %v5786_v42 = vld [vmem:[#allocation5 + $0x768] ss:$16 sps:$4 sm:$0xff]   ;;  %v5791_v43 = vld [vmem:[#allocation5 + $0x54c] ss:$16 sps:$4 sm:$0xff]  }
 0x186   :  { %2199 = vmatprep.subr.bf16.mxu0 %v5701_v44  ;;  %2242 = vmatprep.subr.bf16.mxu1 %v5704_v4  ;;  %v5794_v44 = vld [vmem:[#allocation5 + $0x74c] ss:$16 sps:$4 sm:$0xff]   ;;  %v5789_v4 = vld [vmem:[#allocation5 + $0x548] ss:$16 sps:$4 sm:$0xff]  }
 0x189   :  { %2200 = vmatpush2.bf16.msra.mxu0 %v5699_v5  ;;  %2243 = vmatpush2.bf16.msra.mxu1 %v5702_v6  ;;  %v5792_v5 = vld [vmem:[#allocation5 + $0x748] ss:$16 sps:$4 sm:$0xff]   ;;  %v5797_v6 = vld [vmem:[#allocation5 + $0x52c] ss:$16 sps:$4 sm:$0xff]  }
 0x18a   :  { %2201 = vmatprep.subr.bf16.mxu0 %v5707_v7  ;;  %2244 = vmatprep.subr.bf16.mxu1 %v5710_v10  ;;  %v5800_v7 = vld [vmem:[#allocation5 + $0x72c] ss:$16 sps:$4 sm:$0xff]   ;;  %v5795_v10 = vld [vmem:[#allocation5 + $0x528] ss:$16 sps:$4 sm:$0xff]  }
 0x18d   :  { %2202 = vmatpush2.bf16.msra.mxu0 %v5705_v11  ;;  %2245 = vmatpush2.bf16.msra.mxu1 %v5708_v12  ;;  %v5798_v11 = vld [vmem:[#allocation5 + $0x728] ss:$16 sps:$4 sm:$0xff]   ;;  %v5803_v12 = vld [vmem:[#allocation5 + $0x50c] ss:$16 sps:$4 sm:$0xff]  }
 0x18e   :  { %2257 = vmatprep.subr.bf16.mxu0 %v5713_v13  ;;  %2300 = vmatprep.subr.bf16.mxu1 %v5716_v14  ;;  %v5806_v13 = vld [vmem:[#allocation5 + $0x70c] ss:$16 sps:$4 sm:$0xff]   ;;  %v5801_v14 = vld [vmem:[#allocation5 + $0x508] ss:$16 sps:$4 sm:$0xff]  }
 0x190   :  { %2204 = vmatmul.mubr.bf16.vlgmr.msra.gmra.mxu0 %v6515_v61  ;;  %2247 = vmatmul.mubr.bf16.vlgmr.msra.gmra.mxu1 %v6519_v62  ;;  %v5731_v61 = vld [vmem:[#allocation5 + $0x48c] ss:$16 sps:$4 sm:$0xff]  }
 0x191   :  { %2258 = vmatpush1.bf16.msra.mxu0 %v5711_v15  ;;  %2301 = vmatpush1.bf16.msra.mxu1 %v5714_v55  ;;  %v5734_v62 = vld [vmem:[#allocation5 + $0x68c] ss:$16 sps:$4 sm:$0xff]   ;;  %v5804_v15 = vld [vmem:[#allocation5 + $0x708] ss:$16 sps:$4 sm:$0xff]   ;;  %v5809_v55 = vld [vmem:[#allocation8 + $0xe4] ss:$16 sps:$4 sm:$0xff]  }
 0x192   :  { %2259 = vmatprep.subr.bf16.mxu0 %v5719_v56  ;;  %2302 = vmatprep.subr.bf16.mxu1 %v5722_v57  ;;  %v5807_v56 = vld [vmem:[#allocation8 + $0xe0] ss:$16 sps:$4 sm:$0xff]   ;;  %v5812_v57 = vld [vmem:[#allocation8 + $0xc4] ss:$16 sps:$4 sm:$0xff]  }
 0x193   :  { %2289 = vmatprep.mubr.bf16.mxu0 %v6523_v3  ;;  %2332 = vmatprep.mubr.bf16.mxu1 %v6527_v40  ;;  %v5735_v3 = vld [vmem:[#allocation5 + $0x468] ss:$16 sps:$4 sm:$0xff]  }
 0x194   :  { %v5738_v40 = vld [vmem:[#allocation5 + $0x668] ss:$16 sps:$4 sm:$0xff]  }
 0x195   :  { %2260 = vmatpush1.bf16.msra.mxu0 %v5717_v58  ;;  %2303 = vmatpush1.bf16.msra.mxu1 %v5720_v16  ;;  %v5810_v58 = vld [vmem:[#allocation8 + $0xc0] ss:$16 sps:$4 sm:$0xff]   ;;  %v5815_v16 = vld [vmem:[#allocation8 + $0xa4] ss:$16 sps:$4 sm:$0xff]  }
 0x196   :  { %2261 = vmatprep.subr.bf16.mxu0 %v5725_v17  ;;  %2304 = vmatprep.subr.bf16.mxu1 %v5728_v18  ;;  %v5813_v17 = vld [vmem:[#allocation8 + $0xa0] ss:$16 sps:$4 sm:$0xff]   ;;  %v5818_v18 = vld [vmem:[#allocation8 + $0x84] ss:$16 sps:$4 sm:$0xff]  }
 0x199   :  { %2262 = vmatpush1.bf16.msra.mxu0 %v5723_v19  ;;  %2305 = vmatpush1.bf16.msra.mxu1 %v5726_v20  ;;  %v5816_v19 = vld [vmem:[#allocation8 + $0x80] ss:$16 sps:$4 sm:$0xff]   ;;  %v5821_v20 = vld [vmem:[#allocation8 + $0x64] ss:$16 sps:$4 sm:$0xff]  }
 0x19a   :  { %2263 = vmatprep.subr.bf16.mxu0 %v5731_v61  ;;  %2306 = vmatprep.subr.bf16.mxu1 %v5734_v62  ;;  %v5819_v61 = vld [vmem:[#allocation8 + $0x60] ss:$16 sps:$4 sm:$0xff]   ;;  %v5824_v62 = vld [vmem:[#allocation8 + $0x44] ss:$16 sps:$4 sm:$0xff]  }
 0x19d   :  { %2264 = vmatpush1.bf16.msra.mxu0 %v5729_v21  ;;  %2307 = vmatpush1.bf16.msra.mxu1 %v5732_v49  ;;  %v5903_v21 = vld [vmem:[#allocation8 + $0x2e0] ss:$16 sps:$4 sm:$0xff]   ;;  %v5827_v49 = vld [vmem:[#allocation8 + $0x24] ss:$16 sps:$4 sm:$0xff]  }
 0x19e   :  { %2265 = vmatprep.subr.bf16.mxu0 %v5737_v50  ;;  %2308 = vmatprep.subr.bf16.mxu1 %v5740_v22  ;;  %v5906_v50 = vld [vmem:[#allocation8 + $0x2c0] ss:$16 sps:$4 sm:$0xff]   ;;  %v5908_v22 = vld [vmem:[#allocation8 + $0x2c4] ss:$16 sps:$4 sm:$0xff]  }
 0x1a1   :  { %2266 = vmatpush1.bf16.msra.mxu0 %v5735_v3  ;;  %2309 = vmatpush1.bf16.msra.mxu1 %v5738_v40  ;;  %v5825_v3 = vld [vmem:[#allocation8 + $0x20] ss:$16 sps:$4 sm:$0xff]   ;;  %v5911_v40 = vld [vmem:[#allocation8 + $0x2a4] ss:$16 sps:$4 sm:$0xff]  }
 0x1a2   :  { %2267 = vmatprep.subr.bf16.mxu0 %v5743_v23  ;;  %2310 = vmatprep.subr.bf16.mxu1 %v5746_v24  ;;  %v5830_v23 = vld [vmem:[#allocation8 + $0x4] ss:$16 sps:$4 sm:$0xff]   ;;  %v5909_v24 = vld [vmem:[#allocation8 + $0x2a0] ss:$16 sps:$4 sm:$0xff]  }
 0x1a5   :  { %2268 = vmatpush1.bf16.msra.mxu0 %v5741_v25  ;;  %2311 = vmatpush1.bf16.msra.mxu1 %v5744_v26  ;;  %v5828_v25 = vld [vmem:[#allocation8] ss:$16 sps:$4 sm:$0xff]   ;;  %v5914_v26 = vld [vmem:[#allocation8 + $0x284] ss:$16 sps:$4 sm:$0xff]  }
 0x1a6   :  { %2269 = vmatprep.subr.bf16.mxu0 %v5749_v27  ;;  %2312 = vmatprep.subr.bf16.mxu1 %v5752_v28  ;;  %v5833_v27 = vld [vmem:[#allocation8 + $0x1e4] ss:$16 sps:$4 sm:$0xff]   ;;  %v5912_v28 = vld [vmem:[#allocation8 + $0x280] ss:$16 sps:$4 sm:$0xff]  }
 0x1a9   :  { %2270 = vmatpush1.bf16.msra.mxu0 %v5747_v29  ;;  %2313 = vmatpush1.bf16.msra.mxu1 %v5750_v30  ;;  %v5831_v29 = vld [vmem:[#allocation8 + $0x1e0] ss:$16 sps:$4 sm:$0xff]   ;;  %v5917_v30 = vld [vmem:[#allocation8 + $0x264] ss:$16 sps:$4 sm:$0xff]  }
 0x1aa   :  { %2271 = vmatprep.subr.bf16.mxu0 %v5755_v31  ;;  %2314 = vmatprep.subr.bf16.mxu1 %v5758_v32  ;;  %v5836_v31 = vld [vmem:[#allocation8 + $0x1c4] ss:$16 sps:$4 sm:$0xff]   ;;  %v5915_v32 = vld [vmem:[#allocation8 + $0x260] ss:$16 sps:$4 sm:$0xff]  }
 0x1ad   :  { %2272 = vmatpush1.bf16.msra.mxu0 %v5753_v33  ;;  %2315 = vmatpush1.bf16.msra.mxu1 %v5756_v34  ;;  %v5834_v33 = vld [vmem:[#allocation8 + $0x1c0] ss:$16 sps:$4 sm:$0xff]   ;;  %v5920_v34 = vld [vmem:[#allocation8 + $0x244] ss:$16 sps:$4 sm:$0xff]  }
 0x1ae   :  { %2273 = vmatprep.subr.bf16.mxu0 %v5761_v35  ;;  %2316 = vmatprep.subr.bf16.mxu1 %v5764_v36  ;;  %v5839_v35 = vld [vmem:[#allocation8 + $0x1a4] ss:$16 sps:$4 sm:$0xff]   ;;  %v627_v36 = vpop.f32.mrf.mxu0 }
 0x1b1   :  { %2274 = vmatpush2.bf16.msra.mxu0 %v5759_v38  ;;  %2317 = vmatpush2.bf16.msra.mxu1 %v5762_v39  ;;  %v6551_v38 = vpop.f32.mrf.mxu1  ;;  %v5918_v39 = vld [vmem:[#allocation8 + $0x240] ss:$16 sps:$4 sm:$0xff]  }
 0x1b2   :  { %2275 = vmatprep.subr.bf16.mxu0 %v5767_v41  ;;  %2318 = vmatprep.subr.bf16.mxu1 %v5770_v45  ;;  %v5837_v41 = vld [vmem:[#allocation8 + $0x1a0] ss:$16 sps:$4 sm:$0xff]   ;;  %v5923_v45 = vld [vmem:[#allocation8 + $0x224] ss:$16 sps:$4 sm:$0xff]  }
 0x1b5   :  { %2276 = vmatpush2.bf16.msra.mxu0 %v5765_v46  ;;  %2319 = vmatpush2.bf16.msra.mxu1 %v5768_v47  ;;  %v5842_v46 = vld [vmem:[#allocation8 + $0x184] ss:$16 sps:$4 sm:$0xff]   ;;  %v629_v47 = vpop.f32.mrf.mxu0 }
 0x1b6   :  { %2277 = vmatprep.subr.bf16.mxu0 %v5773_v48  ;;  %2320 = vmatprep.subr.bf16.mxu1 %v5776_v51  ;;  %v6553_v48 = vpop.f32.mrf.mxu1  ;;  %v5921_v51 = vld [vmem:[#allocation8 + $0x220] ss:$16 sps:$4 sm:$0xff]  }
 0x1b9   :  { %2278 = vmatpush2.bf16.msra.mxu0 %v5771_v52  ;;  %2321 = vmatpush2.bf16.msra.mxu1 %v5774_v53  ;;  %v5840_v52 = vld [vmem:[#allocation8 + $0x180] ss:$16 sps:$4 sm:$0xff]   ;;  %v5926_v53 = vld [vmem:[#allocation8 + $0x204] ss:$16 sps:$4 sm:$0xff]  }
 0x1ba   :  { %2279 = vmatprep.subr.bf16.mxu0 %v5779_v54  ;;  %2322 = vmatprep.subr.bf16.mxu1 %v5782_v59  ;;  %v5845_v54 = vld [vmem:[#allocation8 + $0x164] ss:$16 sps:$4 sm:$0xff]   ;;  %v631_v59 = vpop.f32.mrf.mxu0 }
 0x1bd   :  { %2280 = vmatpush2.bf16.msra.mxu0 %v5777_v60  ;;  %2323 = vmatpush2.bf16.msra.mxu1 %v5780_v63  ;;  %v6555_v60 = vpop.f32.mrf.mxu1  ;;  %v5924_v63 = vld [vmem:[#allocation8 + $0x200] ss:$16 sps:$4 sm:$0xff]  }
 0x1be   :  { %2281 = vmatprep.subr.bf16.mxu0 %v5785_v0  ;;  %2324 = vmatprep.subr.bf16.mxu1 %v5788_v1  ;;  %v5843_v0 = vld [vmem:[#allocation8 + $0x160] ss:$16 sps:$4 sm:$0xff]   ;;  %v5929_v1 = vld [vmem:[#allocation8 + $0x3e4] ss:$16 sps:$4 sm:$0xff]  }
 0x1c1   :  { %2282 = vmatpush2.bf16.msra.mxu0 %v5783_v2  ;;  %2325 = vmatpush2.bf16.msra.mxu1 %v5786_v42  ;;  %v5848_v2 = vld [vmem:[#allocation8 + $0x144] ss:$16 sps:$4 sm:$0xff]   ;;  %v633_v42 = vpop.f32.mrf.mxu0 }
 0x1c2   :  { %2283 = vmatprep.subr.bf16.mxu0 %v5791_v43  ;;  %2326 = vmatprep.subr.bf16.mxu1 %v5794_v44  ;;  %v6557_v43 = vpop.f32.mrf.mxu1  ;;  %v5927_v44 = vld [vmem:[#allocation8 + $0x3e0] ss:$16 sps:$4 sm:$0xff]  }
 0x1c5   :  { %2284 = vmatpush2.bf16.msra.mxu0 %v5789_v4  ;;  %2327 = vmatpush2.bf16.msra.mxu1 %v5792_v5  ;;  %v5846_v4 = vld [vmem:[#allocation8 + $0x140] ss:$16 sps:$4 sm:$0xff]   ;;  %v5932_v5 = vld [vmem:[#allocation8 + $0x3c4] ss:$16 sps:$4 sm:$0xff]  }
 0x1c6   :  { %2285 = vmatprep.subr.bf16.mxu0 %v5797_v6  ;;  %2328 = vmatprep.subr.bf16.mxu1 %v5800_v7 }
 0x1c9   :  { %2286 = vmatpush2.bf16.msra.mxu0 %v5795_v10  ;;  %2329 = vmatpush2.bf16.msra.mxu1 %v5798_v11  ;;  %v5851_v10 = vld [vmem:[#allocation8 + $0x124] ss:$16 sps:$4 sm:$0xff]   ;;  %v5930_v11 = vld [vmem:[#allocation8 + $0x3c0] ss:$16 sps:$4 sm:$0xff]  }
 0x1ca   :  { %2287 = vmatprep.subr.bf16.mxu0 %v5803_v12  ;;  %2330 = vmatprep.subr.bf16.mxu1 %v5806_v13  ;;  %v5849_v12 = vld [vmem:[#allocation8 + $0x120] ss:$16 sps:$4 sm:$0xff]   ;;  %v5935_v13 = vld [vmem:[#allocation8 + $0x3a4] ss:$16 sps:$4 sm:$0xff]  }
 0x1cd   :  { %2288 = vmatpush2.bf16.msra.mxu0 %v5801_v14  ;;  %2331 = vmatpush2.bf16.msra.mxu1 %v5804_v15 }
 0x1ce   :  { %3183 = vmatprep.subr.bf16.mxu0 %v5809_v55  ;;  %v5854_v55 = vld [vmem:[#allocation8 + $0x104] ss:$16 sps:$4 sm:$0xff]  }
 0x1d0   :  { %2290 = vmatmul.mubr.bf16.vlgmr.msra.gmra.mxu0 %v6535_v8  ;;  %2333 = vmatmul.mubr.bf16.vlgmr.msra.gmra.mxu1 %v6539_v9  ;;  %v5822_v8 = vld [vmem:[#allocation8 + $0x40] ss:$16 sps:$4 sm:$0xff]   ;;  %v5905_v9 = vld [vmem:[#allocation8 + $0x2e4] ss:$16 sps:$4 sm:$0xff]   ;;  %v2033_v6 = vpop.f32.mrf.mxu0  ;;  %v2076_v7 = vpop.f32.mrf.mxu1 }
 0x1d1   :  { %3184 = vmatpush1.bf16.msra.mxu0 %v5807_v56  ;;  %3226 = vmatprep.subr.bf16.mxu1 %v5905_v9  ;;  %v5933_v56 = vld [vmem:[#allocation8 + $0x3a0] ss:$16 sps:$4 sm:$0xff]  }
 0x1d2   :  { %3185 = vmatprep.subr.bf16.mxu0 %v5812_v57  ;;  %3227 = vmatpush1.bf16.msra.mxu1 %v5903_v21  ;;  %v2035_v14 = vpop.f32.mrf.mxu0  ;;  %v2078_v15 = vpop.f32.mrf.mxu1  ;;  %v5852_v57 = vld [vmem:[#allocation8 + $0x100] ss:$16 sps:$4 sm:$0xff]  }
 0x1d3   :  { %3228 = vmatprep.subr.bf16.mxu1 %v5908_v22 }
 0x1d5   :  { %3186 = vmatpush1.bf16.msra.mxu0 %v5810_v58  ;;  %v5938_v58 = vld [vmem:[#allocation8 + $0x384] ss:$16 sps:$4 sm:$0xff]  }
 0x1d6   :  { %3187 = vmatprep.subr.bf16.mxu0 %v5815_v16  ;;  %3229 = vmatpush1.bf16.msra.mxu1 %v5906_v50  ;;  %v2037_v16 = vpop.f32.mrf.mxu0 }
 0x1d7   :  { %3230 = vmatprep.subr.bf16.mxu1 %v5911_v40 }
 0x1d9   :  { %3188 = vmatpush1.bf16.msra.mxu0 %v5813_v17  ;;  %v2080_v17 = vpop.f32.mrf.mxu1 }
 0x1da   :  { %3189 = vmatprep.subr.bf16.mxu0 %v5818_v18  ;;  %3231 = vmatpush1.bf16.msra.mxu1 %v5909_v24  ;;  %v5857_v18 = vld [vmem:[#allocation8 + $0xec] ss:$16 sps:$4 sm:$0xff]  }
 0x1db   :  { %3232 = vmatprep.subr.bf16.mxu1 %v5914_v26  ;;  %v2082_v21 = vpop.f32.mrf.mxu1 }
 0x1dd   :  { %3190 = vmatpush1.bf16.msra.mxu0 %v5816_v19  ;;  %v2034_v19 = vadd.f32 %v2033_v6, %v627_v36 }
 0x1de   :  { %3191 = vmatprep.subr.bf16.mxu0 %v5821_v20  ;;  %3233 = vmatpush1.bf16.msra.mxu1 %v5912_v28  ;;  %v6560_v20 = vshrl.u32 %v124_v37, 7  ;;  %v5941_v28 = vld [vmem:[#allocation8 + $0x364] ss:$16 sps:$4 sm:$0xff]  }
 0x1df   :  { %3234 = vmatprep.subr.bf16.mxu1 %v5917_v30  ;;  %v2077_v9 = vadd.f32 %v2076_v7, %v2034_v19  ;;  %v5861_v19 = vld [vmem:[#allocation8 + $0xa8] ss:$16 sps:$4 sm:$0xff]  }
 0x1e0   :  { %v6563_v50 = vsub.s32 1, %v6560_v20  ;;  %v6566_v40 = vsub.s32 0, %v6560_v20 }
 0x1e1   :  { %3192 = vmatpush1.bf16.msra.mxu0 %v5819_v61  ;;  %v5936_v61 = vld [vmem:[#allocation8 + $0x380] ss:$16 sps:$4 sm:$0xff]  }
 0x1e2   :  { %3193 = vmatprep.subr.bf16.mxu0 %v5824_v62  ;;  %3235 = vmatpush1.bf16.msra.mxu1 %v5915_v32  ;;  %v2036_v62 = vadd.f32 %v2035_v14, %v629_v47  ;;  %v5939_v32 = vld [vmem:[#allocation8 + $0x360] ss:$16 sps:$4 sm:$0xff]   ;;  %v5944_v47 = vld [vmem:[#allocation8 + $0x344] ss:$16 sps:$4 sm:$0xff]  }
 0x1e3   :  { %3236 = vmatprep.subr.bf16.mxu1 %v5920_v34  ;;  %v5948_v14 = vld [vmem:[#allocation8 + $0x300] ss:$16 sps:$4 sm:$0xff]  }
 0x1e4   :  { %v2079_v37 = vadd.f32 %v2078_v15, %v2036_v62  ;;  %v5864_v62 = vld [vmem:[#allocation8 + $0x88] ss:$16 sps:$4 sm:$0xff]  }
 0x1e5   :  { %3194 = vmatpush1.bf16.msra.mxu0 %v5822_v8  ;;  %v2039_v8 = vpop.f32.mrf.mxu0 }
 0x1e6   :  { %3195 = vmatprep.subr.bf16.mxu0 %v5827_v49  ;;  %3237 = vmatpush1.bf16.msra.mxu1 %v5918_v39  ;;  %v2038_v49 = vadd.f32 %v2037_v16, %v631_v59  ;;  %v5953_v16 = vld [vmem:[#allocation8 + $0x2ec] ss:$16 sps:$4 sm:$0xff]  }
 0x1e7   :  { %3238 = vmatprep.subr.bf16.mxu1 %v5923_v45 }
 0x1e9   :  { %3196 = vmatpush1.bf16.msra.mxu0 %v5825_v3 }
 0x1ea   :  { %3197 = vmatprep.subr.bf16.mxu0 %v5830_v23  ;;  %3239 = vmatpush1.bf16.msra.mxu1 %v5921_v51  ;;  %v2040_v23 = vadd.f32 %v2039_v8, %v633_v42  ;;  %v5869_v8 = vld [vmem:[#allocation8 + $0x6c] ss:$16 sps:$4 sm:$0xff]  }
 0x1eb   :  { %3240 = vmatprep.subr.bf16.mxu1 %v5926_v53 }
 0x1ec   :  { %v2083_v39 = vadd.f32 %v2082_v21, %v2040_v23  ;;  %v5867_v21 = vld [vmem:[#allocation8 + $0x68] ss:$16 sps:$4 sm:$0xff]  }
 0x1ed   :  { %3198 = vmatpush1.bf16.msra.mxu0 %v5828_v25  ;;  %v6571_v25 = vld [vmem:[%s6637_s4] sm:$0xf]  ;;  %v5876_v23 = vld [vmem:[#allocation8 + $0x8] ss:$16 sps:$4 sm:$0xff]  }
 0x1ee   :  { %3199 = vmatprep.subr.bf16.mxu0 %v5833_v27  ;;  %3241 = vmatpush1.bf16.msra.mxu1 %v5924_v63  ;;  %v2348_v34 = vrot.slane %v6571_v25, %v6566_v40 }
 0x1ef   :  { %3242 = vmatprep.subr.bf16.mxu1 %v5929_v1 }
 0x1f1   :  { %3200 = vmatpush2.bf16.msra.mxu0 %v5831_v29  ;;  %v2081_v29 = vadd.f32 %v2080_v17, %v2038_v49  ;;  %v5858_v17 = vld [vmem:[#allocation8 + $0xc8] ss:$16 sps:$4 sm:$0xff]  }
 0x1f2   :  { %3201 = vmatprep.subr.bf16.mxu0 %v5836_v31  ;;  %3243 = vmatpush2.bf16.msra.mxu1 %v5927_v44  ;;  %v2352_v31 = vrot.slane %v6571_v25, %v6563_v50  ;;  %v5870_v49 = vld [vmem:[#allocation8 + $0x48] ss:$16 sps:$4 sm:$0xff]  }
 0x1f3   :  { %3244 = vmatprep.subr.bf16.mxu1 %v5932_v5  ;;  %v5945_v5 = vld [vmem:[#allocation8 + $0x320] ss:$16 sps:$4 sm:$0xff]  }
 0x1f5   :  { %3202 = vmatpush2.bf16.msra.mxu0 %v5834_v33 }
 0x1f6   :  { %3203 = vmatprep.subr.bf16.mxu0 %v5839_v35  ;;  %3245 = vmatpush2.bf16.msra.mxu1 %v5930_v11  ;;  %v5950_v11 = vld [vmem:[#allocation8 + $0x304] ss:$16 sps:$4 sm:$0xff]  }
 0x1f7   :  { %3246 = vmatprep.subr.bf16.mxu1 %v5935_v13 }
 0x1f9   :  { %3204 = vmatpush2.bf16.msra.mxu0 %v5837_v41 }
 0x1fa   :  { %3205 = vmatprep.subr.bf16.mxu0 %v5842_v46  ;;  %3247 = vmatpush2.bf16.msra.mxu1 %v5933_v56  ;;  %v5855_v56 = vld [vmem:[#allocation8 + $0xe8] ss:$16 sps:$4 sm:$0xff]  }
 0x1fb   :  { %3248 = vmatprep.subr.bf16.mxu1 %v5938_v58  ;;  %v5860_v58 = vld [vmem:[#allocation8 + $0xcc] ss:$16 sps:$4 sm:$0xff]  }
 0x1fd   :  { %3206 = vmatpush2.bf16.msra.mxu0 %v5840_v52 }
 0x1fe   :  { %3207 = vmatprep.subr.bf16.mxu0 %v5845_v54  ;;  %3249 = vmatpush2.bf16.msra.mxu1 %v5936_v61  ;;  %v5942_v54 = vld [vmem:[#allocation8 + $0x340] ss:$16 sps:$4 sm:$0xff]   ;;  %v5866_v61 = vld [vmem:[#allocation8 + $0x8c] ss:$16 sps:$4 sm:$0xff]  }
 0x1ff   :  { %3250 = vmatprep.subr.bf16.mxu1 %v5941_v28  ;;  %v5882_v28 = vld [vmem:[#allocation8 + $0x1c8] ss:$16 sps:$4 sm:$0xff]  }
 0x201   :  { %3208 = vmatpush2.bf16.msra.mxu0 %v5843_v0 }
 0x202   :  { %3209 = vmatprep.subr.bf16.mxu0 %v5848_v2  ;;  %3251 = vmatpush2.bf16.msra.mxu1 %v5939_v32  ;;  %v5947_v2 = vld [vmem:[#allocation8 + $0x324] ss:$16 sps:$4 sm:$0xff]   ;;  %v5888_v32 = vld [vmem:[#allocation8 + $0x188] ss:$16 sps:$4 sm:$0xff]  }
 0x203   :  { %3252 = vmatprep.subr.bf16.mxu1 %v5944_v47 }
 0x205   :  { %3210 = vmatpush2.bf16.msra.mxu0 %v5846_v4 }
 0x206   :  { %3211 = vmatprep.subr.bf16.mxu0 %v5851_v10  ;;  %3253 = vmatpush2.bf16.msra.mxu1 %v5942_v54 }
 0x207   :  { %3254 = vmatprep.subr.bf16.mxu1 %v5947_v2 }
 0x209   :  { %3212 = vmatpush2.bf16.msra.mxu0 %v5849_v12 }
 0x20a   :  { %3213 = vmatprep.subr.bf16.mxu0 %v5854_v55  ;;  %3255 = vmatpush2.bf16.msra.mxu1 %v5945_v5 }
 0x20b   :  { %3256 = vmatprep.subr.bf16.mxu1 %v5950_v11 }
 0x20d   :  { %3214 = vmatpush2.bf16.msra.mxu0 %v5852_v57 }
 0x20e   :  { %3269 = vmatprep.subr.bf16.mxu0 %v5857_v18  ;;  %3257 = vmatpush2.bf16.msra.mxu1 %v5948_v14  ;;  %v5863_v18 = vld [vmem:[#allocation8 + $0xac] ss:$16 sps:$4 sm:$0xff]  }
 0x20f   :  { %3312 = vmatprep.subr.bf16.mxu1 %v5953_v16 }
 0x210   :  { %v2119_v22 = vpop.f32.mrf.mxu0  ;;  %v2162_v3 = vpop.f32.mrf.mxu1 }
 0x211   :  { %v2120_v24 = vadd.f32 %v2119_v22, %v2077_v9  ;;  %v5872_v9 = vld [vmem:[#allocation8 + $0x4c] ss:$16 sps:$4 sm:$0xff]  }
 0x212   :  { %v2121_v26 = vpop.f32.mrf.mxu0  ;;  %v2164_v27 = vpop.f32.mrf.mxu1  ;;  %v5875_v22 = vld [vmem:[#allocation8 + $0x2c] ss:$16 sps:$4 sm:$0xff]  }
 0x213   :  { %v2122_v30 = vadd.f32 %v2121_v26, %v2079_v37  ;;  %v2163_v33 = vadd.f32 %v2162_v3, %v2120_v24  ;;  %v5873_v3 = vld [vmem:[#allocation8 + $0x28] ss:$16 sps:$4 sm:$0xff]   ;;  %v5878_v37 = vld [vmem:[#allocation8 + $0xc] ss:$16 sps:$4 sm:$0xff]  }
 0x214   :  { %v2123_v35 = vpop.f32.mrf.mxu0  ;;  %v2166_v36 = vpop.f32.mrf.mxu1  ;;  %v5881_v24 = vld [vmem:[#allocation8 + $0x1ec] ss:$16 sps:$4 sm:$0xff]   ;;  %v5879_v26 = vld [vmem:[#allocation8 + $0x1e8] ss:$16 sps:$4 sm:$0xff]  }
 0x215   :  { %v2165_v41 = vadd.f32 %v2164_v27, %v2122_v30  ;;  %v2124_v45 = vadd.f32 %v2123_v35, %v2081_v29  ;;  %v2365_v59 = vadd.f32 %v2348_v34, %v2163_v33  ;;  %v5884_v27 = vld [vmem:[#allocation8 + $0x1cc] ss:$16 sps:$4 sm:$0xff]   ;;  %v5885_v30 = vld [vmem:[#allocation8 + $0x1a8] ss:$16 sps:$4 sm:$0xff]  }
 0x216   :  { %v2125_v46 = vpop.f32.mrf.mxu0  ;;  %v2168_v63 = vpop.f32.mrf.mxu1  ;;  %v5887_v29 = vld [vmem:[#allocation8 + $0x1ac] ss:$16 sps:$4 sm:$0xff]  }
 0x217   :  { %v2366_v51 = vadd.f32 %v2352_v31, %v2165_v41  ;;  %v2167_v52 = vadd.f32 %v2166_v36, %v2124_v45  ;;  %v2126_v53 = vadd.f32 %v2125_v46, %v2083_v39  ;;  %v2373_v6 = vmul.f32 0.2, %v2365_v59  ;;  %v5893_v33 = vld [vmem:[#allocation8 + $0x16c] ss:$16 sps:$4 sm:$0xff]   ;;  %v5894_v36 = vld [vmem:[#allocation8 + $0x148] ss:$16 sps:$4 sm:$0xff]  }
 0x218   :  { %v5896_v35 = vld [vmem:[#allocation8 + $0x14c] ss:$16 sps:$4 sm:$0xff]   ;;  %v5897_v41 = vld [vmem:[#allocation8 + $0x128] ss:$16 sps:$4 sm:$0xff]  }
 0x219   :  { %v2369_v0 = vadd.f32 %v2348_v34, %v2167_v52  ;;  %v2169_v1 = vadd.f32 %v2168_v63, %v2126_v53  ;;  %v2374_v42 = vmul.f32 0.2, %v2366_v51  ;;  %v2381_v15 = vmax.f32 %v2365_v59, %v2373_v6  ;;  %v5891_v34 = vld [vmem:[#allocation8 + $0x168] ss:$16 sps:$4 sm:$0xff]   ;;  %v5899_v39 = vld [vmem:[#allocation8 + $0x12c] ss:$16 sps:$4 sm:$0xff]  }
 0x21a   :  { %v5902_v45 = vld [vmem:[#allocation8 + $0x10c] ss:$16 sps:$4 sm:$0xff]   ;;  %v5900_v46 = vld [vmem:[#allocation8 + $0x108] ss:$16 sps:$4 sm:$0xff]  }
 0x21b   :  { %v2377_v44 = vmul.f32 0.2, %v2369_v0  ;;  %v2370_v4 = vadd.f32 %v2352_v31, %v2169_v1  ;;  %v2382_v12 = vmax.f32 %v2366_v51, %v2374_v42  ;;  %v5890_v31 = vld [vmem:[#allocation8 + $0x18c] ss:$16 sps:$4 sm:$0xff]  }
 0x21d   :  { %v2378_v7 = vmul.f32 0.2, %v2370_v4  ;;  %v2385_v10 = vmax.f32 %v2369_v0, %v2377_v44 }
 0x21f   :  { %v2386_v13 = vmax.f32 %v2370_v4, %v2378_v7  ;;  %v6577_v57 = vpack.c.bf16 %v2385_v10, %v2381_v15  ;;  %v6585_v4 = vsub.s32 3, %v6560_v20  ;;  %v6588_v7 = vsub.s32 2, %v6560_v20 }
 0x221   :  { %v2390_v55 = vpack.c.bf16 %v2386_v13, %v2382_v12  ;;  %v2360_v15 = vrot.slane %v6571_v25, %v6585_v4 }
 0x223   :  { %3215 = vmatprep.mubr.bf16.mxu0 %v2390_v55 }
 0x224   :  { %3216 = vmatmul.mubr.bf16.vlgmr.msra.gmra.mxu0 %v6577_v57 }
 0x225   :  { %3270 = vmatpush1.bf16.msra.mxu0 %v5855_v56  ;;  %3301 = vmatprep.mubr.bf16.mxu0 %v2390_v55  ;;  %v2356_v55 = vrot.slane %v6571_v25, %v6588_v7 }
 0x226   :  { %3271 = vmatprep.subr.bf16.mxu0 %v5860_v58 }
 0x229   :  { %3272 = vmatpush1.bf16.msra.mxu0 %v5858_v17 }
 0x22a   :  { %3273 = vmatprep.subr.bf16.mxu0 %v5863_v18 }
 0x22d   :  { %3274 = vmatpush1.bf16.msra.mxu0 %v5861_v19 }
 0x22e   :  { %3275 = vmatprep.subr.bf16.mxu0 %v5866_v61 }
 0x231   :  { %3276 = vmatpush1.bf16.msra.mxu0 %v5864_v62 }
 0x232   :  { %3277 = vmatprep.subr.bf16.mxu0 %v5869_v8 }
 0x235   :  { %3278 = vmatpush1.bf16.msra.mxu0 %v5867_v21 }
 0x236   :  { %3279 = vmatprep.subr.bf16.mxu0 %v5872_v9 }
 0x239   :  { %3280 = vmatpush1.bf16.msra.mxu0 %v5870_v49 }
 0x23a   :  { %3281 = vmatprep.subr.bf16.mxu0 %v5875_v22 }
 0x23d   :  { %3282 = vmatpush1.bf16.msra.mxu0 %v5873_v3 }
 0x23e   :  { %3283 = vmatprep.subr.bf16.mxu0 %v5878_v37 }
 0x241   :  { %3284 = vmatpush1.bf16.msra.mxu0 %v5876_v23 }
 0x242   :  { %3285 = vmatprep.subr.bf16.mxu0 %v5881_v24 }
 0x245   :  { %3286 = vmatpush2.bf16.msra.mxu0 %v5879_v26 }
 0x246   :  { %3287 = vmatprep.subr.bf16.mxu0 %v5884_v27 }
 0x249   :  { %3288 = vmatpush2.bf16.msra.mxu0 %v5882_v28  ;;  %v5951_v28 = vld [vmem:[#allocation8 + $0x2e8] ss:$16 sps:$4 sm:$0xff]  }
 0x24a   :  { %3289 = vmatprep.subr.bf16.mxu0 %v5887_v29 }
 0x24d   :  { %3290 = vmatpush2.bf16.msra.mxu0 %v5885_v30  ;;  %v5956_v30 = vld [vmem:[#allocation8 + $0x2cc] ss:$16 sps:$4 sm:$0xff]  }
 0x24e   :  { %3291 = vmatprep.subr.bf16.mxu0 %v5890_v31  ;;  %v5954_v31 = vld [vmem:[#allocation8 + $0x2c8] ss:$16 sps:$4 sm:$0xff]  }
 0x250   :  { %v2205_v47 = vpop.f32.mrf.mxu0  ;;  %v2248_v51 = vpop.f32.mrf.mxu1 }
 0x251   :  { %3292 = vmatpush2.bf16.msra.mxu0 %v5888_v32  ;;  %v2206_v63 = vadd.f32 %v2205_v47, %v6551_v38  ;;  %v5959_v32 = vld [vmem:[#allocation8 + $0x2ac] ss:$16 sps:$4 sm:$0xff]   ;;  %v6007_v47 = vld [vmem:[#allocation10 + $0xa4] ss:$16 sps:$4 sm:$0xff]  }
 0x252   :  { %3293 = vmatprep.subr.bf16.mxu0 %v5893_v33  ;;  %v2207_v52 = vpop.f32.mrf.mxu0  ;;  %v2250_v53 = vpop.f32.mrf.mxu1  ;;  %v5957_v33 = vld [vmem:[#allocation8 + $0x2a8] ss:$16 sps:$4 sm:$0xff]  }
 0x253   :  { %v2208_v0 = vadd.f32 %v2207_v52, %v6553_v48  ;;  %v2249_v42 = vadd.f32 %v2248_v51, %v2206_v63  ;;  %v5963_v51 = vld [vmem:[#allocation8 + $0x268] ss:$16 sps:$4 sm:$0xff]   ;;  %v5968_v52 = vld [vmem:[#allocation8 + $0x24c] ss:$16 sps:$4 sm:$0xff]  }
 0x254   :  { %v2209_v54 = vpop.f32.mrf.mxu0  ;;  %v2252_v59 = vpop.f32.mrf.mxu1  ;;  %v5971_v63 = vld [vmem:[#allocation8 + $0x22c] ss:$16 sps:$4 sm:$0xff]  }
 0x255   :  { %3294 = vmatpush2.bf16.msra.mxu0 %v5891_v34  ;;  %v2210_v44 = vadd.f32 %v2209_v54, %v6555_v60  ;;  %v2251_v10 = vadd.f32 %v2250_v53, %v2208_v0  ;;  %v5962_v34 = vld [vmem:[#allocation8 + $0x28c] ss:$16 sps:$4 sm:$0xff]   ;;  %v6005_v53 = vld [vmem:[#allocation10 + $0xa0] ss:$16 sps:$4 sm:$0xff]   ;;  %v6010_v54 = vld [vmem:[#allocation10 + $0x84] ss:$16 sps:$4 sm:$0xff]  }
 0x256   :  { %3295 = vmatprep.subr.bf16.mxu0 %v5896_v35  ;;  %v2211_v1 = vpop.f32.mrf.mxu0  ;;  %v2254_v2 = vpop.f32.mrf.mxu1  ;;  %v5999_v35 = vld [vmem:[#allocation10 + $0xe0] ss:$16 sps:$4 sm:$0xff]  }
 0x257   :  { %v2212_v11 = vadd.f32 %v2211_v1, %v6557_v43  ;;  %v2253_v48 = vadd.f32 %v2252_v59, %v2210_v44  ;;  %v5966_v59 = vld [vmem:[#allocation8 + $0x248] ss:$16 sps:$4 sm:$0xff]   ;;  %v6008_v0 = vld [vmem:[#allocation10 + $0x80] ss:$16 sps:$4 sm:$0xff]   ;;  %v6013_v1 = vld [vmem:[#allocation10 + $0x64] ss:$16 sps:$4 sm:$0xff]  }
 0x258   :  { %v6011_v44 = vld [vmem:[#allocation10 + $0x60] ss:$16 sps:$4 sm:$0xff]  }
 0x259   :  { %3296 = vmatpush2.bf16.msra.mxu0 %v5894_v36  ;;  %v2255_v58 = vadd.f32 %v2254_v2, %v2212_v11  ;;  %v6001_v36 = vld [vmem:[#allocation10 + $0xe4] ss:$16 sps:$4 sm:$0xff]   ;;  %v5969_v2 = vld [vmem:[#allocation8 + $0x228] ss:$16 sps:$4 sm:$0xff]   ;;  %v6014_v11 = vld [vmem:[#allocation10 + $0x40] ss:$16 sps:$4 sm:$0xff]  }
 0x25a   :  { %3297 = vmatprep.subr.bf16.mxu0 %v5899_v39  ;;  %v6004_v39 = vld [vmem:[#allocation10 + $0xc4] ss:$16 sps:$4 sm:$0xff]  }
 0x25d   :  { %3298 = vmatpush2.bf16.msra.mxu0 %v5897_v41  ;;  %v5960_v41 = vld [vmem:[#allocation8 + $0x288] ss:$16 sps:$4 sm:$0xff]  }
 0x25e   :  { %3299 = vmatprep.subr.bf16.mxu0 %v5902_v45  ;;  %v5965_v45 = vld [vmem:[#allocation8 + $0x26c] ss:$16 sps:$4 sm:$0xff]  }
 0x261   :  { %3300 = vmatpush2.bf16.msra.mxu0 %v5900_v46  ;;  %v6002_v46 = vld [vmem:[#allocation10 + $0xc0] ss:$16 sps:$4 sm:$0xff]  }
 0x262   :  { %4165 = vmatprep.subr.bf16.mxu0 %v6001_v36  ;;  %v6053_v36 = vld [vmem:[#allocation10 + $0x2c0] ss:$16 sps:$4 sm:$0xff]  }
 0x264   :  { %3302 = vmatmul.mubr.bf16.vlgmr.msra.gmra.mxu0 %v6577_v57 }
 0x265   :  { %4166 = vmatpush1.bf16.msra.mxu0 %v5999_v35  ;;  %v6052_v35 = vld [vmem:[#allocation10 + $0xec] ss:$16 sps:$4 sm:$0xff]  }
 0x266   :  { %4167 = vmatprep.subr.bf16.mxu0 %v6004_v39  ;;  %v6059_v39 = vld [vmem:[#allocation10 + $0x2a0] ss:$16 sps:$4 sm:$0xff]  }
 0x269   :  { %4168 = vmatpush1.bf16.msra.mxu0 %v6002_v46  ;;  %v6067_v46 = vld [vmem:[#allocation10 + $0x284] ss:$16 sps:$4 sm:$0xff]  }
 0x26a   :  { %4169 = vmatprep.subr.bf16.mxu0 %v6007_v47  ;;  %v6071_v47 = vld [vmem:[#allocation10 + $0x260] ss:$16 sps:$4 sm:$0xff]  }
 0x26d   :  { %4170 = vmatpush1.bf16.msra.mxu0 %v6005_v53  ;;  %v6079_v53 = vld [vmem:[#allocation10 + $0x244] ss:$16 sps:$4 sm:$0xff]  }
 0x26e   :  { %4171 = vmatprep.subr.bf16.mxu0 %v6010_v54  ;;  %v6083_v54 = vld [vmem:[#allocation10 + $0x220] ss:$16 sps:$4 sm:$0xff]  }
 0x271   :  { %4172 = vmatpush1.bf16.msra.mxu0 %v6008_v0  ;;  %v6091_v0 = vld [vmem:[#allocation10 + $0x204] ss:$16 sps:$4 sm:$0xff]  }
 0x272   :  { %4173 = vmatprep.subr.bf16.mxu0 %v6013_v1  ;;  %v6095_v1 = vld [vmem:[#allocation10 + $0x3e0] ss:$16 sps:$4 sm:$0xff]  }
 0x275   :  { %4174 = vmatpush1.bf16.msra.mxu0 %v6011_v44  ;;  %v6103_v44 = vld [vmem:[#allocation10 + $0x3c4] ss:$16 sps:$4 sm:$0xff]  }
 0x290   :  { %v2291_v5 = vpop.f32.mrf.mxu0  ;;  %v2334_v6 = vpop.f32.mrf.mxu1 }
 0x291   :  { %v2292_v12 = vadd.f32 %v2291_v5, %v2249_v42  ;;  %v5974_v42 = vld [vmem:[#allocation8 + $0x20c] ss:$16 sps:$4 sm:$0xff]   ;;  %v6016_v5 = vld [vmem:[#allocation10 + $0x44] ss:$16 sps:$4 sm:$0xff]  }
 0x292   :  { %v2293_v38 = vpop.f32.mrf.mxu0  ;;  %v2336_v13 = vpop.f32.mrf.mxu1  ;;  %4175 = vmatprep.subr.bf16.mxu0 %v6016_v5  ;;  %v6107_v5 = vld [vmem:[#allocation10 + $0x3a0] ss:$16 sps:$4 sm:$0xff]  }
 0x293   :  { %v2294_v14 = vadd.f32 %v2293_v38, %v2251_v10  ;;  %v2335_v60 = vadd.f32 %v2334_v6, %v2292_v12  ;;  %v5972_v6 = vld [vmem:[#allocation8 + $0x208] ss:$16 sps:$4 sm:$0xff]   ;;  %v5977_v10 = vld [vmem:[#allocation8 + $0x3ec] ss:$16 sps:$4 sm:$0xff]   ;;  %v6019_v12 = vld [vmem:[#allocation10 + $0x24] ss:$16 sps:$4 sm:$0xff]   ;;  %4176 = vmatpush1.bf16.msra.mxu0 %v6014_v11 }
 0x294   :  { %v2295_v56 = vpop.f32.mrf.mxu0  ;;  %v2338_v57 = vpop.f32.mrf.mxu1  ;;  %v5975_v38 = vld [vmem:[#allocation8 + $0x3e8] ss:$16 sps:$4 sm:$0xff]   ;;  %4177 = vmatprep.subr.bf16.mxu0 %v6019_v12  ;;  %v6115_v11 = vld [vmem:[#allocation10 + $0x384] ss:$16 sps:$4 sm:$0xff]   ;;  %v6119_v12 = vld [vmem:[#allocation10 + $0x360] ss:$16 sps:$4 sm:$0xff]  }
 0x295   :  { %v2337_v20 = vadd.f32 %v2336_v13, %v2294_v14  ;;  %v2296_v16 = vadd.f32 %v2295_v56, %v2253_v48  ;;  %v2367_v61 = vadd.f32 %v2356_v55, %v2335_v60  ;;  %v5980_v13 = vld [vmem:[#allocation8 + $0x3cc] ss:$16 sps:$4 sm:$0xff]   ;;  %v6017_v48 = vld [vmem:[#allocation10 + $0x20] ss:$16 sps:$4 sm:$0xff]   ;;  %v6022_v14 = vld [vmem:[#allocation10 + $0x4] ss:$16 sps:$4 sm:$0xff]  }
 0x296   :  { %v2297_v17 = vpop.f32.mrf.mxu0  ;;  %v2340_v62 = vpop.f32.mrf.mxu1  ;;  %v5983_v60 = vld [vmem:[#allocation8 + $0x3ac] ss:$16 sps:$4 sm:$0xff]   ;;  %v6025_v56 = vld [vmem:[#allocation10 + $0x1e4] ss:$16 sps:$4 sm:$0xff]  }
 0x297   :  { %v2368_v18 = vadd.f32 %v2360_v15, %v2337_v20  ;;  %v2339_v43 = vadd.f32 %v2338_v57, %v2296_v16  ;;  %v2298_v19 = vadd.f32 %v2297_v17, %v2255_v58  ;;  %v2375_v3 = vmul.f32 0.2, %v2367_v61  ;;  %4178 = vmatpush1.bf16.msra.mxu0 %v6017_v48  ;;  %v5981_v57 = vld [vmem:[#allocation8 + $0x3a8] ss:$16 sps:$4 sm:$0xff]   ;;  %v5986_v58 = vld [vmem:[#allocation8 + $0x38c] ss:$16 sps:$4 sm:$0xff]  }
 0x298   :  { %4179 = vmatprep.subr.bf16.mxu0 %v6022_v14  ;;  %v6023_v20 = vld [vmem:[#allocation10 + $0x1e0] ss:$16 sps:$4 sm:$0xff]   ;;  %v6028_v16 = vld [vmem:[#allocation10 + $0x1c4] ss:$16 sps:$4 sm:$0xff]   ;;  %v5984_v17 = vld [vmem:[#allocation8 + $0x388] ss:$16 sps:$4 sm:$0xff]  }
 0x299   :  { %v2371_v8 = vadd.f32 %v2356_v55, %v2339_v43  ;;  %v2341_v21 = vadd.f32 %v2340_v62, %v2298_v19  ;;  %v2376_v9 = vmul.f32 0.2, %v2368_v18  ;;  %v2383_v26 = vmax.f32 %v2367_v61, %v2375_v3  ;;  %v6020_v55 = vld [vmem:[#allocation10] ss:$16 sps:$4 sm:$0xff]   ;;  %v6031_v19 = vld [vmem:[#allocation10 + $0x1a4] ss:$16 sps:$4 sm:$0xff]  }
 0x29a   :  { %v6026_v43 = vld [vmem:[#allocation10 + $0x1c0] ss:$16 sps:$4 sm:$0xff]   ;;  %v5987_v61 = vld [vmem:[#allocation8 + $0x368] ss:$16 sps:$4 sm:$0xff]   ;;  %v5992_v62 = vld [vmem:[#allocation8 + $0x34c] ss:$16 sps:$4 sm:$0xff]  }
 0x29b   :  { %v2379_v49 = vmul.f32 0.2, %v2371_v8  ;;  %v2372_v22 = vadd.f32 %v2360_v15, %v2341_v21  ;;  %v2384_v25 = vmax.f32 %v2368_v18, %v2376_v9  ;;  %v5978_v15 = vld [vmem:[#allocation8 + $0x3c8] ss:$16 sps:$4 sm:$0xff]   ;;  %4180 = vmatpush1.bf16.msra.mxu0 %v6020_v55  ;;  %v5989_v18 = vld [vmem:[#allocation8 + $0x36c] ss:$16 sps:$4 sm:$0xff]  }
 0x29c   :  { %4181 = vmatprep.subr.bf16.mxu0 %v6025_v56  ;;  %v6034_v21 = vld [vmem:[#allocation10 + $0x184] ss:$16 sps:$4 sm:$0xff]   ;;  %v5990_v9 = vld [vmem:[#allocation8 + $0x348] ss:$16 sps:$4 sm:$0xff]   ;;  %v6125_v48 = vld [vmem:[#allocation10 + $0x340] ss:$16 sps:$4 sm:$0xff]  }
 0x29d   :  { %v2380_v37 = vmul.f32 0.2, %v2372_v22  ;;  %v2387_v23 = vmax.f32 %v2371_v8, %v2379_v49  ;;  %v6029_v8 = vld [vmem:[#allocation10 + $0x1a0] ss:$16 sps:$4 sm:$0xff]   ;;  %v5995_v49 = vld [vmem:[#allocation8 + $0x32c] ss:$16 sps:$4 sm:$0xff]  }
 0x29e   :  { %v6037_v3 = vld [vmem:[#allocation10 + $0x164] ss:$16 sps:$4 sm:$0xff]   ;;  %v6137_v55 = vld [vmem:[#allocation10 + $0x300] ss:$16 sps:$4 sm:$0xff]   ;;  %v6145_v56 = vld [vmem:[#allocation10 + $0x2ec] ss:$16 sps:$4 sm:$0xff]  }
 0x29f   :  { %v2388_v24 = vmax.f32 %v2372_v22, %v2380_v37  ;;  %v6595_v29 = vpack.c.bf16 %v2387_v23, %v2383_v26  ;;  %4182 = vmatpush2.bf16.msra.mxu0 %v6023_v20  ;;  %v6032_v22 = vld [vmem:[#allocation10 + $0x180] ss:$16 sps:$4 sm:$0xff]   ;;  %v5993_v37 = vld [vmem:[#allocation8 + $0x328] ss:$16 sps:$4 sm:$0xff]   ;;  %v5998_v23 = vld [vmem:[#allocation8 + $0x30c] ss:$16 sps:$4 sm:$0xff]  }
 0x2a0   :  { %4183 = vmatprep.subr.bf16.mxu0 %v6028_v16  ;;  %v6040_v26 = vld [vmem:[#allocation10 + $0x144] ss:$16 sps:$4 sm:$0xff]   ;;  %v6602_v20 = vld [vmem:[%s6639_s6] sm:$0xf] }
 0x2a1   :  { %v2392_v27 = vpack.c.bf16 %v2388_v24, %v2384_v25  ;;  %v6035_v25 = vld [vmem:[#allocation10 + $0x160] ss:$16 sps:$4 sm:$0xff]   ;;  %v5996_v24 = vld [vmem:[#allocation8 + $0x308] ss:$16 sps:$4 sm:$0xff]   ;;  %v6133_v14 = vld [vmem:[#allocation10 + $0x324] ss:$16 sps:$4 sm:$0xff]   ;;  %v2530_v16 = vrot.slane %v6602_v20, %v6563_v50 }
 0x2a3   :  { %3258 = vmatprep.mubr.bf16.mxu1 %v2392_v27  ;;  %4184 = vmatpush2.bf16.msra.mxu0 %v6026_v43 }
 0x2a4   :  { %3259 = vmatmul.mubr.bf16.vlgmr.msra.gmra.mxu1 %v6595_v29  ;;  %4185 = vmatprep.subr.bf16.mxu0 %v6031_v19 }
 0x2a5   :  { %3313 = vmatpush1.bf16.msra.mxu1 %v5951_v28  ;;  %3344 = vmatprep.mubr.bf16.mxu1 %v2392_v27  ;;  %v6038_v27 = vld [vmem:[#allocation10 + $0x140] ss:$16 sps:$4 sm:$0xff]   ;;  %v6043_v28 = vld [vmem:[#allocation10 + $0x124] ss:$16 sps:$4 sm:$0xff]  }
 0x2a6   :  { %3314 = vmatprep.subr.bf16.mxu1 %v5956_v30  ;;  %v6041_v30 = vld [vmem:[#allocation10 + $0x120] ss:$16 sps:$4 sm:$0xff]  }
 0x2a7   :  { %4186 = vmatpush2.bf16.msra.mxu0 %v6029_v8 }
 0x2a8   :  { %4187 = vmatprep.subr.bf16.mxu0 %v6034_v21 }
 0x2a9   :  { %3315 = vmatpush1.bf16.msra.mxu1 %v5954_v31  ;;  %v6046_v31 = vld [vmem:[#allocation10 + $0x104] ss:$16 sps:$4 sm:$0xff]  }
 0x2aa   :  { %3316 = vmatprep.subr.bf16.mxu1 %v5959_v32  ;;  %v6044_v32 = vld [vmem:[#allocation10 + $0x100] ss:$16 sps:$4 sm:$0xff]  }
 0x2ab   :  { %4188 = vmatpush2.bf16.msra.mxu0 %v6032_v22 }
 0x2ac   :  { %4189 = vmatprep.subr.bf16.mxu0 %v6037_v3 }
 0x2ad   :  { %3317 = vmatpush1.bf16.msra.mxu1 %v5957_v33  ;;  %v6047_v33 = vld [vmem:[#allocation10 + $0x2e0] ss:$16 sps:$4 sm:$0xff]  }
 0x2ae   :  { %3318 = vmatprep.subr.bf16.mxu1 %v5962_v34  ;;  %v6049_v34 = vld [vmem:[#allocation10 + $0x2e4] ss:$16 sps:$4 sm:$0xff]  }
 0x2af   :  { %4190 = vmatpush2.bf16.msra.mxu0 %v6035_v25 }
 0x2b0   :  { %4191 = vmatprep.subr.bf16.mxu0 %v6040_v26 }
 0x2b1   :  { %3319 = vmatpush1.bf16.msra.mxu1 %v5960_v41  ;;  %v6061_v41 = vld [vmem:[#allocation10 + $0x2a4] ss:$16 sps:$4 sm:$0xff]  }
 0x2b2   :  { %3320 = vmatprep.subr.bf16.mxu1 %v5965_v45  ;;  %v6065_v45 = vld [vmem:[#allocation10 + $0x280] ss:$16 sps:$4 sm:$0xff]  }
 0x2b3   :  { %4192 = vmatpush2.bf16.msra.mxu0 %v6038_v27 }
 0x2b4   :  { %4193 = vmatprep.subr.bf16.mxu0 %v6043_v28 }
 0x2b5   :  { %3321 = vmatpush1.bf16.msra.mxu1 %v5963_v51  ;;  %v6073_v51 = vld [vmem:[#allocation10 + $0x264] ss:$16 sps:$4 sm:$0xff]  }
 0x2b6   :  { %3322 = vmatprep.subr.bf16.mxu1 %v5968_v52  ;;  %v6077_v52 = vld [vmem:[#allocation10 + $0x240] ss:$16 sps:$4 sm:$0xff]  }
 0x2b7   :  { %4194 = vmatpush2.bf16.msra.mxu0 %v6041_v30 }
 0x2b8   :  { %4195 = vmatprep.subr.bf16.mxu0 %v6046_v31 }
 0x2b9   :  { %3323 = vmatpush1.bf16.msra.mxu1 %v5966_v59  ;;  %v6085_v59 = vld [vmem:[#allocation10 + $0x224] ss:$16 sps:$4 sm:$0xff]  }
 0x2ba   :  { %3324 = vmatprep.subr.bf16.mxu1 %v5971_v63  ;;  %v6089_v63 = vld [vmem:[#allocation10 + $0x200] ss:$16 sps:$4 sm:$0xff]  }
 0x2bb   :  { %4196 = vmatpush2.bf16.msra.mxu0 %v6044_v32 }
 0x2bc   :  { %4251 = vmatprep.subr.bf16.mxu0 %v6052_v35  ;;  %v6050_v35 = vld [vmem:[#allocation10 + $0xe8] ss:$16 sps:$4 sm:$0xff]  }
 0x2bd   :  { %3325 = vmatpush1.bf16.msra.mxu1 %v5969_v2  ;;  %v6097_v2 = vld [vmem:[#allocation10 + $0x3e4] ss:$16 sps:$4 sm:$0xff]  }
 0x2be   :  { %3326 = vmatprep.subr.bf16.mxu1 %v5974_v42  ;;  %v6101_v42 = vld [vmem:[#allocation10 + $0x3c0] ss:$16 sps:$4 sm:$0xff]  }
 0x2c1   :  { %3327 = vmatpush1.bf16.msra.mxu1 %v5972_v6  ;;  %v6109_v6 = vld [vmem:[#allocation10 + $0x3a4] ss:$16 sps:$4 sm:$0xff]  }
 0x2c2   :  { %3328 = vmatprep.subr.bf16.mxu1 %v5977_v10  ;;  %v6113_v10 = vld [vmem:[#allocation10 + $0x380] ss:$16 sps:$4 sm:$0xff]  }
 0x2c5   :  { %3329 = vmatpush2.bf16.msra.mxu1 %v5975_v38  ;;  %v6121_v38 = vld [vmem:[#allocation10 + $0x364] ss:$16 sps:$4 sm:$0xff]  }
 0x2c6   :  { %3330 = vmatprep.subr.bf16.mxu1 %v5980_v13  ;;  %v6127_v13 = vld [vmem:[#allocation10 + $0x344] ss:$16 sps:$4 sm:$0xff]  }
 0x2c9   :  { %3331 = vmatpush2.bf16.msra.mxu1 %v5978_v15  ;;  %v6131_v15 = vld [vmem:[#allocation10 + $0x320] ss:$16 sps:$4 sm:$0xff]  }
 0x2ca   :  { %3332 = vmatprep.subr.bf16.mxu1 %v5983_v60  ;;  %v6139_v60 = vld [vmem:[#allocation10 + $0x304] ss:$16 sps:$4 sm:$0xff]  }
 0x2cd   :  { %3333 = vmatpush2.bf16.msra.mxu1 %v5981_v57 }
 0x2ce   :  { %3334 = vmatprep.subr.bf16.mxu1 %v5986_v58 }
 0x2d1   :  { %3335 = vmatpush2.bf16.msra.mxu1 %v5984_v17  ;;  %v2526_v17 = vrot.slane %v6602_v20, %v6566_v40 }
 0x2d2   :  { %3336 = vmatprep.subr.bf16.mxu1 %v5989_v18 }
 0x2d5   :  { %3337 = vmatpush2.bf16.msra.mxu1 %v5987_v61 }
 0x2d6   :  { %3338 = vmatprep.subr.bf16.mxu1 %v5992_v62 }
 0x2d9   :  { %3339 = vmatpush2.bf16.msra.mxu1 %v5990_v9 }
 0x2da   :  { %3340 = vmatprep.subr.bf16.mxu1 %v5995_v49 }
 0x2dd   :  { %3341 = vmatpush2.bf16.msra.mxu1 %v5993_v37 }
 0x2de   :  { %3342 = vmatprep.subr.bf16.mxu1 %v5998_v23 }
 0x2e1   :  { %3343 = vmatpush2.bf16.msra.mxu1 %v5996_v24 }
 0x2e2   :  { %4208 = vmatprep.subr.bf16.mxu1 %v6049_v34 }
 0x2e4   :  { %3345 = vmatmul.mubr.bf16.vlgmr.msra.gmra.mxu1 %v6595_v29  ;;  %v6055_v29 = vld [vmem:[#allocation10 + $0x2c4] ss:$16 sps:$4 sm:$0xff]   ;;  %v3217_v57 = vpop.f32.mrf.mxu0 }
 0x2e5   :  { %4209 = vmatpush1.bf16.msra.mxu1 %v6047_v33  ;;  %v3218_v61 = vadd.f32 %v3217_v57, %v2526_v17 }
 0x2e6   :  { %4210 = vmatprep.subr.bf16.mxu1 %v6055_v29  ;;  %v3219_v58 = vpop.f32.mrf.mxu0  ;;  %v6058_v29 = vld [vmem:[#allocation10 + $0xcc] ss:$16 sps:$4 sm:$0xff]  }
 0x2e7   :  { %v3220_v19 = vadd.f32 %v3219_v58, %v2530_v16 }
 0x2e8   :  { %v3221_v18 = vpop.f32.mrf.mxu0 }
 0x2e9   :  { %4211 = vmatpush1.bf16.msra.mxu1 %v6053_v36  ;;  %v3222_v21 = vadd.f32 %v3221_v18, %v2526_v17 }
 0x2ea   :  { %4212 = vmatprep.subr.bf16.mxu1 %v6061_v41  ;;  %v3223_v62 = vpop.f32.mrf.mxu0  ;;  %v6064_v41 = vld [vmem:[#allocation10 + $0xac] ss:$16 sps:$4 sm:$0xff]  }
 0x2eb   :  { %v3224_v3 = vadd.f32 %v3223_v62, %v2530_v16  ;;  %v6128_v16 = vld [vmem:[#allocation10 + $0x148] ss:$16 sps:$4 sm:$0xff]  }
 0x2ed   :  { %4213 = vmatpush1.bf16.msra.mxu1 %v6059_v39  ;;  %v6056_v39 = vld [vmem:[#allocation10 + $0xc8] ss:$16 sps:$4 sm:$0xff]  }
 0x2ee   :  { %4214 = vmatprep.subr.bf16.mxu1 %v6067_v46  ;;  %v6070_v46 = vld [vmem:[#allocation10 + $0x8c] ss:$16 sps:$4 sm:$0xff]  }
 0x2f1   :  { %4215 = vmatpush1.bf16.msra.mxu1 %v6065_v45  ;;  %v6062_v45 = vld [vmem:[#allocation10 + $0xa8] ss:$16 sps:$4 sm:$0xff]  }
 0x2f2   :  { %4216 = vmatprep.subr.bf16.mxu1 %v6073_v51  ;;  %v6076_v51 = vld [vmem:[#allocation10 + $0x6c] ss:$16 sps:$4 sm:$0xff]  }
 0x2f5   :  { %4217 = vmatpush1.bf16.msra.mxu1 %v6071_v47  ;;  %v6068_v47 = vld [vmem:[#allocation10 + $0x88] ss:$16 sps:$4 sm:$0xff]  }
 0x2f6   :  { %4218 = vmatprep.subr.bf16.mxu1 %v6079_v53  ;;  %v6082_v53 = vld [vmem:[#allocation10 + $0x4c] ss:$16 sps:$4 sm:$0xff]  }
 0x2f9   :  { %4219 = vmatpush1.bf16.msra.mxu1 %v6077_v52  ;;  %v6074_v52 = vld [vmem:[#allocation10 + $0x68] ss:$16 sps:$4 sm:$0xff]  }
 0x2fa   :  { %4220 = vmatprep.subr.bf16.mxu1 %v6085_v59  ;;  %v6088_v59 = vld [vmem:[#allocation10 + $0x2c] ss:$16 sps:$4 sm:$0xff]  }
 0x2fd   :  { %4221 = vmatpush1.bf16.msra.mxu1 %v6083_v54  ;;  %v6080_v54 = vld [vmem:[#allocation10 + $0x48] ss:$16 sps:$4 sm:$0xff]  }
 0x2fe   :  { %4222 = vmatprep.subr.bf16.mxu1 %v6091_v0  ;;  %v6094_v0 = vld [vmem:[#allocation10 + $0xc] ss:$16 sps:$4 sm:$0xff]  }
 0x301   :  { %4223 = vmatpush1.bf16.msra.mxu1 %v6089_v63  ;;  %v6086_v63 = vld [vmem:[#allocation10 + $0x28] ss:$16 sps:$4 sm:$0xff]  }
 0x302   :  { %4224 = vmatprep.subr.bf16.mxu1 %v6097_v2  ;;  %v6100_v2 = vld [vmem:[#allocation10 + $0x1ec] ss:$16 sps:$4 sm:$0xff]  }
 0x305   :  { %4225 = vmatpush2.bf16.msra.mxu1 %v6095_v1  ;;  %v6092_v1 = vld [vmem:[#allocation10 + $0x8] ss:$16 sps:$4 sm:$0xff]  }
 0x306   :  { %4226 = vmatprep.subr.bf16.mxu1 %v6103_v44  ;;  %v6106_v44 = vld [vmem:[#allocation10 + $0x1cc] ss:$16 sps:$4 sm:$0xff]  }
 0x309   :  { %4227 = vmatpush2.bf16.msra.mxu1 %v6101_v42  ;;  %v6098_v42 = vld [vmem:[#allocation10 + $0x1e8] ss:$16 sps:$4 sm:$0xff]  }
 0x30a   :  { %4228 = vmatprep.subr.bf16.mxu1 %v6109_v6  ;;  %v6112_v6 = vld [vmem:[#allocation10 + $0x1ac] ss:$16 sps:$4 sm:$0xff]  }
 0x30d   :  { %4229 = vmatpush2.bf16.msra.mxu1 %v6107_v5  ;;  %v6104_v5 = vld [vmem:[#allocation10 + $0x1c8] ss:$16 sps:$4 sm:$0xff]  }
 0x30e   :  { %4230 = vmatprep.subr.bf16.mxu1 %v6115_v11 }
 0x311   :  { %4231 = vmatpush2.bf16.msra.mxu1 %v6113_v10  ;;  %v6110_v10 = vld [vmem:[#allocation10 + $0x1a8] ss:$16 sps:$4 sm:$0xff]  }
 0x312   :  { %4232 = vmatprep.subr.bf16.mxu1 %v6121_v38  ;;  %v6116_v38 = vld [vmem:[#allocation10 + $0x188] ss:$16 sps:$4 sm:$0xff]  }
 0x315   :  { %4233 = vmatpush2.bf16.msra.mxu1 %v6119_v12  ;;  %v6118_v12 = vld [vmem:[#allocation10 + $0x18c] ss:$16 sps:$4 sm:$0xff]  }
 0x316   :  { %4234 = vmatprep.subr.bf16.mxu1 %v6127_v13 }
 0x319   :  { %4235 = vmatpush2.bf16.msra.mxu1 %v6125_v48  ;;  %v6124_v48 = vld [vmem:[#allocation10 + $0x16c] ss:$16 sps:$4 sm:$0xff]  }
 0x31a   :  { %4236 = vmatprep.subr.bf16.mxu1 %v6133_v14  ;;  %v2538_v14 = vrot.slane %v6602_v20, %v6585_v4 }
 0x31d   :  { %4237 = vmatpush2.bf16.msra.mxu1 %v6131_v15  ;;  %v6122_v15 = vld [vmem:[#allocation10 + $0x168] ss:$16 sps:$4 sm:$0xff]  }
 0x31e   :  { %4238 = vmatprep.subr.bf16.mxu1 %v6139_v60  ;;  %v2534_v60 = vrot.slane %v6602_v20, %v6588_v7  ;;  %v6134_v20 = vld [vmem:[#allocation10 + $0x128] ss:$16 sps:$4 sm:$0xff]  }
 0x321   :  { %4239 = vmatpush2.bf16.msra.mxu1 %v6137_v55 }
 0x322   :  { %4294 = vmatprep.subr.bf16.mxu1 %v6145_v56  ;;  %v6130_v56 = vld [vmem:[#allocation10 + $0x14c] ss:$16 sps:$4 sm:$0xff]  }
 0x324   :  { %v3303_v11 = vpop.f32.mrf.mxu0 }
 0x325   :  { %v3304_v17 = vadd.f32 %v3303_v11, %v2534_v60  ;;  %v6164_v11 = vld [vmem:[#allocation10 + $0x208] ss:$16 sps:$4 sm:$0xff]  }
 0x326   :  { %v3305_v13 = vpop.f32.mrf.mxu0 }
 0x327   :  { %v3306_v58 = vadd.f32 %v3305_v13, %v2538_v14  ;;  %v6172_v13 = vld [vmem:[#allocation10 + $0x3cc] ss:$16 sps:$4 sm:$0xff]  }
 0x328   :  { %v3307_v55 = vpop.f32.mrf.mxu0 }
 0x32a   :  { %v3309_v18 = vpop.f32.mrf.mxu0 }
 0x364   :  { %v3260_v43 = vpop.f32.mrf.mxu1 }
 0x365   :  { %v3261_v49 = vadd.f32 %v3260_v43, %v3218_v61  ;;  %v3308_v61 = vadd.f32 %v3307_v55, %v2534_v60  ;;  %v6178_v60 = vld [vmem:[#allocation10 + $0x38c] ss:$16 sps:$4 sm:$0xff]   ;;  %v6176_v55 = vld [vmem:[#allocation10 + $0x388] ss:$16 sps:$4 sm:$0xff]  }
 0x366   :  { %v3262_v8 = vpop.f32.mrf.mxu1 }
 0x367   :  { %v3263_v9 = vadd.f32 %v3262_v8, %v3220_v19  ;;  %v3355_v27 = vmul.f32 0.2, %v3261_v49  ;;  %v6136_v19 = vld [vmem:[#allocation10 + $0x12c] ss:$16 sps:$4 sm:$0xff]  }
 0x368   :  { %v3264_v22 = vpop.f32.mrf.mxu1 }
 0x369   :  { %v3265_v37 = vadd.f32 %v3264_v22, %v3222_v21  ;;  %v3356_v25 = vmul.f32 0.2, %v3263_v9  ;;  %v3363_v33 = vmax.f32 %v3261_v49, %v3355_v27  ;;  %v6140_v27 = vld [vmem:[#allocation10 + $0x108] ss:$16 sps:$4 sm:$0xff]  }
 0x36a   :  { %v3266_v23 = vpop.f32.mrf.mxu1 }
 0x36b   :  { %v3359_v24 = vmul.f32 0.2, %v3265_v37  ;;  %v3267_v26 = vadd.f32 %v3266_v23, %v3224_v3  ;;  %v3364_v31 = vmax.f32 %v3263_v9, %v3356_v25  ;;  %v3310_v9 = vadd.f32 %v3309_v18, %v2538_v14  ;;  %v6142_v3 = vld [vmem:[#allocation10 + $0x10c] ss:$16 sps:$4 sm:$0xff]   ;;  %v6185_v18 = vld [vmem:[#allocation10 + $0x328] ss:$16 sps:$4 sm:$0xff]  }
 0x36c   :  { %v6175_v14 = vld [vmem:[#allocation10 + $0x3ac] ss:$16 sps:$4 sm:$0xff]  }
 0x36d   :  { %v3360_v28 = vmul.f32 0.2, %v3267_v26  ;;  %v3367_v30 = vmax.f32 %v3265_v37, %v3359_v24 }
 0x36f   :  { %v3368_v32 = vmax.f32 %v3267_v26, %v3360_v28  ;;  %v6608_v36 = vpack.c.bf16 %v3367_v30, %v3363_v33 }
 0x371   :  { %v3372_v34 = vpack.c.bf16 %v3368_v32, %v3364_v31 }
 0x373   :  { %4197 = vmatprep.mubr.bf16.mxu0 %v3372_v34 }
 0x374   :  { %4198 = vmatmul.mubr.bf16.vlgmr.msra.gmra.mxu0 %v6608_v36 }
 0x375   :  { %4252 = vmatpush1.bf16.msra.mxu0 %v6050_v35  ;;  %4283 = vmatprep.mubr.bf16.mxu0 %v3372_v34  ;;  %v6143_v34 = vld [vmem:[#allocation10 + $0x2e8] ss:$16 sps:$4 sm:$0xff]  }
 0x376   :  { %4253 = vmatprep.subr.bf16.mxu0 %v6058_v29  ;;  %v6148_v29 = vld [vmem:[#allocation10 + $0x2cc] ss:$16 sps:$4 sm:$0xff]  }
 0x379   :  { %4254 = vmatpush1.bf16.msra.mxu0 %v6056_v39  ;;  %v6146_v39 = vld [vmem:[#allocation10 + $0x2c8] ss:$16 sps:$4 sm:$0xff]  }
 0x37a   :  { %4255 = vmatprep.subr.bf16.mxu0 %v6064_v41  ;;  %v6151_v41 = vld [vmem:[#allocation10 + $0x2ac] ss:$16 sps:$4 sm:$0xff]  }
 0x37d   :  { %4256 = vmatpush1.bf16.msra.mxu0 %v6062_v45  ;;  %v6149_v45 = vld [vmem:[#allocation10 + $0x2a8] ss:$16 sps:$4 sm:$0xff]  }
 0x37e   :  { %4257 = vmatprep.subr.bf16.mxu0 %v6070_v46  ;;  %v6154_v46 = vld [vmem:[#allocation10 + $0x28c] ss:$16 sps:$4 sm:$0xff]  }
 0x381   :  { %4258 = vmatpush1.bf16.msra.mxu0 %v6068_v47  ;;  %v6191_v47 = vld [vmem:[#allocation11 + $0x78] sm:$0xff]  }
 0x382   :  { %4259 = vmatprep.subr.bf16.mxu0 %v6076_v51  ;;  %v6192_v51 = vld [vmem:[#allocation11 + $0x38] sm:$0xff]  }
 0x385   :  { %4260 = vmatpush1.bf16.msra.mxu0 %v6074_v52  ;;  %v6193_v52 = vld [vmem:[#allocation11 + $0x70] sm:$0xff]  }
 0x386   :  { %4261 = vmatprep.subr.bf16.mxu0 %v6082_v53  ;;  %v6152_v53 = vld [vmem:[#allocation10 + $0x288] ss:$16 sps:$4 sm:$0xff]  }
 0x389   :  { %4262 = vmatpush1.bf16.msra.mxu0 %v6080_v54  ;;  %v6157_v54 = vld [vmem:[#allocation10 + $0x26c] ss:$16 sps:$4 sm:$0xff]  }
 0x38a   :  { %4263 = vmatprep.subr.bf16.mxu0 %v6088_v59  ;;  %v6194_v59 = vld [vmem:[#allocation11 + $0x30] sm:$0xff]  }
 0x38d   :  { %4264 = vmatpush1.bf16.msra.mxu0 %v6086_v63  ;;  %v6155_v63 = vld [vmem:[#allocation10 + $0x268] ss:$16 sps:$4 sm:$0xff]  }
 0x38e   :  { %4265 = vmatprep.subr.bf16.mxu0 %v6094_v0  ;;  %v6160_v0 = vld [vmem:[#allocation10 + $0x24c] ss:$16 sps:$4 sm:$0xff]  }
 0x391   :  { %4266 = vmatpush1.bf16.msra.mxu0 %v6092_v1  ;;  %v6196_v1 = vld [vmem:[#allocation11 + $0x28] sm:$0xff]  }
 0x392   :  { %4267 = vmatprep.subr.bf16.mxu0 %v6100_v2  ;;  %v6197_v2 = vld [vmem:[#allocation11 + $0x60] sm:$0xff]  }
 0x395   :  { %4268 = vmatpush2.bf16.msra.mxu0 %v6098_v42  ;;  %v6158_v42 = vld [vmem:[#allocation10 + $0x248] ss:$16 sps:$4 sm:$0xff]  }
 0x396   :  { %4269 = vmatprep.subr.bf16.mxu0 %v6106_v44  ;;  %v6163_v44 = vld [vmem:[#allocation10 + $0x22c] ss:$16 sps:$4 sm:$0xff]  }
 0x399   :  { %4270 = vmatpush2.bf16.msra.mxu0 %v6104_v5  ;;  %v6198_v5 = vld [vmem:[#allocation11 + $0x20] sm:$0xff]  }
 0x39a   :  { %4271 = vmatprep.subr.bf16.mxu0 %v6112_v6  ;;  %v6161_v6 = vld [vmem:[#allocation10 + $0x228] ss:$16 sps:$4 sm:$0xff]  }
 0x39d   :  { %4272 = vmatpush2.bf16.msra.mxu0 %v6110_v10  ;;  %v6166_v10 = vld [vmem:[#allocation10 + $0x20c] ss:$16 sps:$4 sm:$0xff]  }
 0x39e   :  { %4273 = vmatprep.subr.bf16.mxu0 %v6118_v12  ;;  %v6169_v12 = vld [vmem:[#allocation10 + $0x3ec] ss:$16 sps:$4 sm:$0xff]  }
 0x3a1   :  { %4274 = vmatpush2.bf16.msra.mxu0 %v6116_v38  ;;  %v6167_v38 = vld [vmem:[#allocation10 + $0x3e8] ss:$16 sps:$4 sm:$0xff]  }
 0x3a2   :  { %4275 = vmatprep.subr.bf16.mxu0 %v6124_v48  ;;  %v6170_v48 = vld [vmem:[#allocation10 + $0x3c8] ss:$16 sps:$4 sm:$0xff]  }
 0x3a4   :  { %v3346_v57 = vpop.f32.mrf.mxu1 }
 0x3a5   :  { %4276 = vmatpush2.bf16.msra.mxu0 %v6122_v15  ;;  %v3347_v8 = vadd.f32 %v3346_v57, %v3304_v17  ;;  %v6173_v15 = vld [vmem:[#allocation10 + $0x3a8] ss:$16 sps:$4 sm:$0xff]   ;;  %v6187_v17 = vld [vmem:[#allocation10 + $0x32c] ss:$16 sps:$4 sm:$0xff]  }
 0x3a6   :  { %v3348_v43 = vpop.f32.mrf.mxu1  ;;  %4277 = vmatprep.subr.bf16.mxu0 %v6130_v56  ;;  %v6181_v56 = vld [vmem:[#allocation10 + $0x36c] ss:$16 sps:$4 sm:$0xff]   ;;  %v6179_v57 = vld [vmem:[#allocation10 + $0x368] ss:$16 sps:$4 sm:$0xff]  }
 0x3a7   :  { %v3349_v62 = vadd.f32 %v3348_v43, %v3306_v58  ;;  %v3357_v24 = vmul.f32 0.2, %v3347_v8  ;;  %v6184_v58 = vld [vmem:[#allocation10 + $0x34c] ss:$16 sps:$4 sm:$0xff]  }
 0x3a8   :  { %v3350_v21 = vpop.f32.mrf.mxu1  ;;  %v6190_v43 = vld [vmem:[#allocation10 + $0x30c] ss:$16 sps:$4 sm:$0xff]  }
 0x3a9   :  { %v3351_v49 = vadd.f32 %v3350_v21, %v3308_v61  ;;  %4278 = vmatpush2.bf16.msra.mxu0 %v6128_v16  ;;  %v3358_v37 = vmul.f32 0.2, %v3349_v62  ;;  %v3365_v32 = vmax.f32 %v3347_v8, %v3357_v24  ;;  %v6182_v16 = vld [vmem:[#allocation10 + $0x348] ss:$16 sps:$4 sm:$0xff]   ;;  %v6201_v8 = vld [vmem:[#allocation11 + $0x50] sm:$0xff]  }
 0x3aa   :  { %v3352_v22 = vpop.f32.mrf.mxu1  ;;  %4279 = vmatprep.subr.bf16.mxu0 %v6136_v19  ;;  %v6188_v19 = vld [vmem:[#allocation10 + $0x308] ss:$16 sps:$4 sm:$0xff]   ;;  %v6202_v21 = vld [vmem:[#allocation11 + $0x10] sm:$0xff]  }
 0x3ab   :  { %v3361_v23 = vmul.f32 0.2, %v3351_v49  ;;  %v3353_v25 = vadd.f32 %v3352_v22, %v3310_v9  ;;  %v3366_v30 = vmax.f32 %v3349_v62, %v3358_v37  ;;  %v6199_v61 = vld [vmem:[#allocation11 + $0x58] sm:$0xff]   ;;  %v6203_v9 = vld [vmem:[#allocation11 + $0x48] sm:$0xff]   ;;  %v6206_v22 = vld [vmem:[#allocation11] sm:$0xff]  }
 0x3ac   :  { %v6200_v62 = vld [vmem:[#allocation11 + $0x18] sm:$0xff]   ;;  %v6211_v24 = vld [vmem:[#allocation11 + $0xe8] sm:$0xff]  }
 0x3ad   :  { %v3362_v26 = vmul.f32 0.2, %v3353_v25  ;;  %4280 = vmatpush2.bf16.msra.mxu0 %v6134_v20  ;;  %v3369_v28 = vmax.f32 %v3351_v49, %v3361_v23  ;;  %v6204_v49 = vld [vmem:[#allocation11 + $0x8] sm:$0xff]   ;;  %v6205_v20 = vld [vmem:[#allocation11 + $0x40] sm:$0xff]   ;;  %v6208_v37 = vld [vmem:[#allocation11 + $0xb8] sm:$0xff]  }
 0x3ae   :  { %4281 = vmatprep.subr.bf16.mxu0 %v6142_v3  ;;  %v6207_v3 = vld [vmem:[#allocation11 + $0xf8] sm:$0xff]   ;;  %v6209_v23 = vld [vmem:[#allocation11 + $0xf0] sm:$0xff]  }
 0x3af   :  { %v3370_v31 = vmax.f32 %v3353_v25, %v3362_v26  ;;  %v6615_v35 = vpack.c.bf16 %v3369_v28, %v3365_v32  ;;  %v6210_v25 = vld [vmem:[#allocation11 + $0xb0] sm:$0xff]   ;;  %v6212_v26 = vld [vmem:[#allocation11 + $0xa8] sm:$0xff]   ;;  %v6214_v28 = vld [vmem:[#allocation11 + $0xa0] sm:$0xff]  }
 0x3b0   :  { %v6217_v32 = vld [vmem:[#allocation11 + $0xd0] sm:$0xff]  }
 0x3b1   :  { %4282 = vmatpush2.bf16.msra.mxu0 %v6140_v27  ;;  %v3374_v33 = vpack.c.bf16 %v3370_v31, %v3366_v30  ;;  %v6213_v27 = vld [vmem:[#allocation11 + $0xe0] sm:$0xff]   ;;  %v6215_v30 = vld [vmem:[#allocation11 + $0xd8] sm:$0xff]  }
 0x3b2   :  { %5313 = vmatprep.subr.bf16.mxu0 %v6191_v47  ;;  %v6216_v31 = vld [vmem:[#allocation11 + $0x98] sm:$0xff]  }
 0x3b3   :  { %4240 = vmatprep.mubr.bf16.mxu1 %v3374_v33 }
 0x3b4   :  { %4241 = vmatmul.mubr.bf16.vlgmr.msra.gmra.mxu1 %v6615_v35  ;;  %4284 = vmatmul.mubr.bf16.vlgmr.msra.gmra.mxu0 %v6608_v36  ;;  %v6195_v36 = vld [vmem:[#allocation11 + $0x68] sm:$0xff]  }
 0x3b5   :  { %4295 = vmatpush1.bf16.msra.mxu1 %v6143_v34  ;;  %4326 = vmatprep.mubr.bf16.mxu1 %v3374_v33  ;;  %v6218_v33 = vld [vmem:[#allocation11 + $0x90] sm:$0xff]   ;;  %v6219_v34 = vld [vmem:[#allocation11 + $0xc8] sm:$0xff]  }
 0x3b6   :  { %4296 = vmatprep.subr.bf16.mxu1 %v6148_v29  ;;  %5314 = vmatpush3.bf16.msra.mxu0 %v6192_v51  ;;  %v6221_v29 = vld [vmem:[#allocation11 + $0xc0] sm:$0xff]  }
 0x3b7   :  { %5315 = vmatprep.subr.bf16.mxu0 %v6193_v52 }
 0x3b9   :  { %4297 = vmatpush1.bf16.msra.mxu1 %v6146_v39  ;;  %v6222_v39 = vld [vmem:[#allocation11 + $0x80] sm:$0xff]  }
 0x3ba   :  { %4298 = vmatprep.subr.bf16.mxu1 %v6151_v41  ;;  %5316 = vmatpush3.bf16.msra.mxu0 %v6194_v59 }
 0x3bb   :  { %5317 = vmatprep.subr.bf16.mxu0 %v6195_v36 }
 0x3bd   :  { %4299 = vmatpush1.bf16.msra.mxu1 %v6149_v45 }
 0x3be   :  { %4300 = vmatprep.subr.bf16.mxu1 %v6154_v46  ;;  %5318 = vmatpush3.bf16.msra.mxu0 %v6196_v1  ;;  %v3503_v46 = vld [vmem:[%s6641_s8] sm:$0xf] }
 0x3bf   :  { %5319 = vmatprep.subr.bf16.mxu0 %v6197_v2  ;;  %v3512_v47 = vrot.slane %v3503_v46, %v6563_v50  ;;  %v3508_v51 = vrot.slane %v3503_v46, %v6566_v40 }
 0x3c1   :  { %4301 = vmatpush1.bf16.msra.mxu1 %v6152_v53 }
 0x3c2   :  { %4302 = vmatprep.subr.bf16.mxu1 %v6157_v54  ;;  %5320 = vmatpush3.bf16.msra.mxu0 %v6198_v5 }
 0x3c3   :  { %5321 = vmatprep.subr.bf16.mxu0 %v6199_v61 }
 0x3c5   :  { %4303 = vmatpush1.bf16.msra.mxu1 %v6155_v63 }
 0x3c6   :  { %4304 = vmatprep.subr.bf16.mxu1 %v6160_v0  ;;  %5322 = vmatpush3.bf16.msra.mxu0 %v6200_v62 }
 0x3c7   :  { %5323 = vmatprep.subr.bf16.mxu0 %v6201_v8 }
 0x3c9   :  { %4305 = vmatpush1.bf16.msra.mxu1 %v6158_v42 }
 0x3ca   :  { %4306 = vmatprep.subr.bf16.mxu1 %v6163_v44  ;;  %5324 = vmatpush3.bf16.msra.mxu0 %v6202_v21 }
 0x3cb   :  { %5325 = vmatprep.subr.bf16.mxu0 %v6203_v9 }
 0x3cd   :  { %4307 = vmatpush1.bf16.msra.mxu1 %v6161_v6 }
 0x3ce   :  { %4308 = vmatprep.subr.bf16.mxu1 %v6166_v10  ;;  %5326 = vmatpush3.bf16.msra.mxu0 %v6204_v49 }
 0x3cf   :  { %5327 = vmatprep.subr.bf16.mxu0 %v6205_v20 }
 0x3d1   :  { %4309 = vmatpush1.bf16.msra.mxu1 %v6164_v11 }
 0x3d2   :  { %4310 = vmatprep.subr.bf16.mxu1 %v6169_v12  ;;  %5328 = vmatpush3.bf16.msra.mxu0 %v6206_v22 }
 0x3d5   :  { %4311 = vmatpush2.bf16.msra.mxu1 %v6167_v38 }
 0x3d6   :  { %4312 = vmatprep.subr.bf16.mxu1 %v6172_v13 }
 0x3d9   :  { %4313 = vmatpush2.bf16.msra.mxu1 %v6170_v48 }
 0x3da   :  { %4314 = vmatprep.subr.bf16.mxu1 %v6175_v14 }
 0x3dd   :  { %4315 = vmatpush2.bf16.msra.mxu1 %v6173_v15 }
 0x3de   :  { %4316 = vmatprep.subr.bf16.mxu1 %v6178_v60 }
 0x3e1   :  { %4317 = vmatpush2.bf16.msra.mxu1 %v6176_v55 }
 0x3e2   :  { %4318 = vmatprep.subr.bf16.mxu1 %v6181_v56 }
 0x3e5   :  { %4319 = vmatpush2.bf16.msra.mxu1 %v6179_v57  ;;  %v3520_v57 = vrot.slane %v3503_v46, %v6585_v4 }
 0x3e6   :  { %4320 = vmatprep.subr.bf16.mxu1 %v6184_v58  ;;  %v3516_v58 = vrot.slane %v3503_v46, %v6588_v7 }
 0x3e9   :  { %4321 = vmatpush2.bf16.msra.mxu1 %v6182_v16 }
 0x3ea   :  { %4322 = vmatprep.subr.bf16.mxu1 %v6187_v17 }
 0x3ed   :  { %4323 = vmatpush2.bf16.msra.mxu1 %v6185_v18 }
 0x3ee   :  { %4324 = vmatprep.subr.bf16.mxu1 %v6190_v43 }
 0x3f1   :  { %4325 = vmatpush2.bf16.msra.mxu1 %v6188_v19 }
 0x3f2   :  { %5335 = vmatprep.subr.bf16.mxu1 %v6207_v3 }
 0x3f4   :  { %4327 = vmatmul.mubr.bf16.vlgmr.msra.gmra.mxu1 %v6615_v35  ;;  %v6220_v35 = vld [vmem:[#allocation11 + $0x88] sm:$0xff]  }
 0x3f5   :  { %5336 = vmatpush3.bf16.msra.mxu1 %v6208_v37 }
 0x3f6   :  { %5337 = vmatprep.subr.bf16.mxu1 %v6209_v23 }
 0x3f9   :  { %5338 = vmatpush3.bf16.msra.mxu1 %v6210_v25 }
 0x3fa   :  { %5339 = vmatprep.subr.bf16.mxu1 %v6211_v24 }
 0x3fd   :  { %5340 = vmatpush3.bf16.msra.mxu1 %v6212_v26 }
 0x3fe   :  { %5341 = vmatprep.subr.bf16.mxu1 %v6213_v27 }
 0x401   :  { %5342 = vmatpush3.bf16.msra.mxu1 %v6214_v28 }
 0x402   :  { %5343 = vmatprep.subr.bf16.mxu1 %v6215_v30 }
 0x405   :  { %5344 = vmatpush3.bf16.msra.mxu1 %v6216_v31 }
 0x406   :  { %5345 = vmatprep.subr.bf16.mxu1 %v6217_v32 }
 0x409   :  { %5346 = vmatpush3.bf16.msra.mxu1 %v6218_v33 }
 0x40a   :  { %5347 = vmatprep.subr.bf16.mxu1 %v6219_v34 }
 0x40d   :  { %5348 = vmatpush3.bf16.msra.mxu1 %v6220_v35  ;;  %v5280_v35 = vld [vmem:[%s6643_s10] ss:$0 sm:$0xff] }
 0x40e   :  { %5349 = vmatprep.subr.bf16.mxu1 %v6221_v29 }
 0x411   :  { %5350 = vmatpush3.bf16.msra.mxu1 %v6222_v39 }
 0x434   :  { %v4199_v41 = vpop.f32.mrf.mxu0 }
 0x435   :  { %v4200_v59 = vadd.f32 %v4199_v41, %v3508_v51 }
 0x436   :  { %v4201_v45 = vpop.f32.mrf.mxu0 }
 0x437   :  { %v4202_v54 = vadd.f32 %v4201_v45, %v3512_v47 }
 0x438   :  { %v4203_v52 = vpop.f32.mrf.mxu0 }
 0x439   :  { %v4204_v0 = vadd.f32 %v4203_v52, %v3508_v51 }
 0x43a   :  { %v4205_v36 = vpop.f32.mrf.mxu0 }
 0x43b   :  { %v4206_v44 = vadd.f32 %v4205_v36, %v3512_v47 }
 0x474   :  { %v4242_v53 = vpop.f32.mrf.mxu1  ;;  %v4285_v55 = vpop.f32.mrf.mxu0 }
 0x475   :  { %v4243_v2 = vadd.f32 %v4242_v53, %v4200_v59  ;;  %v4286_v43 = vadd.f32 %v4285_v55, %v3516_v58 }
 0x476   :  { %v4244_v63 = vpop.f32.mrf.mxu1  ;;  %v4287_v56 = vpop.f32.mrf.mxu0 }
 0x477   :  { %v4245_v1 = vadd.f32 %v4244_v63, %v4202_v54  ;;  %v4337_v38 = vmul.f32 0.2, %v4243_v2  ;;  %v4288_v18 = vadd.f32 %v4287_v56, %v3520_v57 }
 0x478   :  { %v4246_v42 = vpop.f32.mrf.mxu1  ;;  %v4289_v16 = vpop.f32.mrf.mxu0 }
 0x479   :  { %v4247_v5 = vadd.f32 %v4246_v42, %v4204_v0  ;;  %v4338_v10 = vmul.f32 0.2, %v4245_v1  ;;  %v4345_v14 = vmax.f32 %v4243_v2, %v4337_v38  ;;  %v4290_v62 = vadd.f32 %v4289_v16, %v3516_v58 }
 0x47a   :  { %v4248_v6 = vpop.f32.mrf.mxu1  ;;  %v4291_v19 = vpop.f32.mrf.mxu0 }
 0x47b   :  { %v4341_v11 = vmul.f32 0.2, %v4247_v5  ;;  %v4249_v12 = vadd.f32 %v4248_v6, %v4206_v44  ;;  %v4346_v40 = vmax.f32 %v4245_v1, %v4338_v10  ;;  %v4292_v49 = vadd.f32 %v4291_v19, %v3520_v57 }
 0x47d   :  { %v4342_v50 = vmul.f32 0.2, %v4249_v12  ;;  %v4349_v13 = vmax.f32 %v4247_v5, %v4341_v11 }
 0x47f   :  { %v4350_v48 = vmax.f32 %v4249_v12, %v4342_v50  ;;  %v4353_v60 = vpack.c.bf16 %v4349_v13, %v4345_v14 }
 0x481   :  { %v4354_v15 = vpack.c.bf16 %v4350_v48, %v4346_v40 }
 0x483   :  { %4652 = vmatprep.mubr.bf16.mxu0 %v4354_v15 }
 0x484   :  { %4653 = vmatmul.mubr.bf16.vlgmr.msra.gmra.mxu0 %v4353_v60 }
 0x4b4   :  { %v4328_v17 = vpop.f32.mrf.mxu1 }
 0x4b5   :  { %v4329_v21 = vadd.f32 %v4328_v17, %v4286_v43 }
 0x4b6   :  { %v4330_v61 = vpop.f32.mrf.mxu1 }
 0x4b7   :  { %v4331_v8 = vadd.f32 %v4330_v61, %v4288_v18  ;;  %v4339_v25 = vmul.f32 0.2, %v4329_v21 }
 0x4b8   :  { %v4332_v9 = vpop.f32.mrf.mxu1 }
 0x4b9   :  { %v4333_v20 = vadd.f32 %v4332_v9, %v4290_v62  ;;  %v4340_v3 = vmul.f32 0.2, %v4331_v8  ;;  %v4347_v27 = vmax.f32 %v4329_v21, %v4339_v25 }
 0x4ba   :  { %v4334_v22 = vpop.f32.mrf.mxu1 }
 0x4bb   :  { %v4343_v37 = vmul.f32 0.2, %v4333_v20  ;;  %v4335_v23 = vadd.f32 %v4334_v22, %v4292_v49  ;;  %v4348_v7 = vmax.f32 %v4331_v8, %v4340_v3 }
 0x4bd   :  { %v4344_v4 = vmul.f32 0.2, %v4335_v23  ;;  %v4351_v24 = vmax.f32 %v4333_v20, %v4343_v37 }
 0x4bf   :  { %v4352_v26 = vmax.f32 %v4335_v23, %v4344_v4  ;;  %v4355_v30 = vpack.c.bf16 %v4351_v24, %v4347_v27 }
 0x4c1   :  { %v4356_v28 = vpack.c.bf16 %v4352_v26, %v4348_v7 }
 0x4c3   :  { %4693 = vmatprep.mubr.bf16.mxu1 %v4356_v28 }
 0x4c4   :  { %4694 = vmatmul.mubr.bf16.vlgmr.msra.gmra.mxu1 %v4355_v30 }
 0x544   :  { %v5329_v31 = vpop.f32.mrf.mxu0 }
 0x546   :  { %v5330_v32 = vpop.f32.mrf.mxu0 }
 0x547   :  { %v5331_v34 = vadd.f32 %v5330_v32, %v5329_v31 }
 0x548   :  { %v5332_v33 = vpop.f32.mrf.mxu0 }
 0x549   :  { %v4655_v45 = vadd.f32 %v5331_v34, %v5280_v35 }
 0x54a   :  { %v5333_v29 = vpop.f32.mrf.mxu0 }
 0x54b   :  { %v5334_v46 = vadd.f32 %v5333_v29, %v5332_v33 }
 0x54d   :  { %v4658_v54 = vadd.f32 %v5334_v46, %v5280_v35 }
 0x584   :  { %v5351_v39 = vpop.f32.mrf.mxu1 }
 0x586   :  { %v5352_v41 = vpop.f32.mrf.mxu1 }
 0x587   :  { %v5353_v47 = vadd.f32 %v5352_v41, %v5351_v39 }
 0x588   :  { %v5354_v51 = vpop.f32.mrf.mxu1 }
 0x589   :  { %v4696_v52 = vadd.f32 %v5353_v47, %v4655_v45 }
 0x58a   :  { %v5355_v53 = vpop.f32.mrf.mxu1 }
 0x58b   :  { %4702 = vst [vmem:[#allocation13] sm:$0xff] %v4696_v52  ;;  %v5356_v59 = vadd.f32 %v5355_v53, %v5354_v51 }
 0x58d   :  { %v4699_v36 = vadd.f32 %v5356_v59, %v4658_v54 }
 0x58f   :  { %4703 = vst [vmem:[#allocation13 + $0x8] sm:$0xff] %v4699_v36 }
 0x590   :  { %6354 = shalt.err (!%p6351_p6)
}
 0x591   :  { %s6388_s10 = smov 128   ;;  %s6389_s19 = smov 8  }
 0x592   :  { %4715 = dma.vmem_to_hbm [thread:$0]  %s4710_s17, 256, %s6644_s11, [#allocation4], %s6388_s10, %s6388_s10, %s6389_s19  }
 0x593   :  { %6371 = dma.done.wait [#allocation4], 256  }
 0x594   :  { %6372 = vsyncadd [#allocation4], 4294967040 }
 0x595   :  { %4719 = vsyncpa [#allocation3], 1 }
 0x596   :  { %4720 = vsyncpa [#allocation6], 1 }
 0x597   :  { %4721 = vsyncpa [#allocation9], 1 }
 0x598   :  { %4722 = vsyncpa [#allocation12], 1 }
 0x599   :  { %4723 = vsyncpa [#allocation4], 1 }

</bundles_post_ra>
